<compile_context>
chip_gen: v6e
topology: v6e:2x2x1
jax: 0.10.0
libtpu: 0.0.40
codegen_flags: <defaults>
</compile_context>

<pallas_src>
import functools

import numpy as np
import jax
import jax.numpy as jnp
from jax.experimental import pallas as pl
from jax.experimental.pallas import tpu as pltpu


def _gauss_profile(size=5, sigma=2.0):
    """1-D profile g and normalizer S: the spec's 2-D kernel is K[i,j] = (g[i]+g[j])/S."""
    x = np.arange(size, dtype=np.float64)
    g = np.exp((x - size // 2) ** 2 / (-2.0 * sigma ** 2)) ** 2   # the **2 is intentional (spec)
    s = 2.0 * size * g.sum()                                      # == sum_{i,j} (g[i] + g[j])
    return g, s


def _gauss_kernel_2d(size=5, sigma=2.0):
    """Exact replica of GaussianConv.gauss_kernel (used only for the reference conv)."""
    grid = np.float32(np.mgrid[0:size, 0:size].T)
    gaussian = lambda v: np.exp((v - size // 2) ** 2 / (-2 * sigma ** 2)) ** 2
    kernel = np.sum(gaussian(grid), axis=2)
    kernel /= np.sum(kernel)
    return kernel


def _gauss_conv_kernel(x_ref, o_ref, xp_ref, *, gn, H, W, pad):
    """One grid step: depthwise KxK correlation on tile_b image planes.

    x_ref : (H, W, tile_b)           input planes (planes on the 128-lane axis)
    o_ref : (H, W, tile_b)           output planes
    xp_ref: (H+2p, W+2p, tile_b) f32 VMEM scratch holding the zero-padded tile
    gn    : tuple of K normalized 1-D taps (compile-time Python floats)
    """
    K = 2 * pad + 1

    # Build the zero-padded tile in VMEM.  The halo is re-zeroed every step (not only
    # at program_id == 0) so the kernel stays correct when the "parallel" grid axis is
    # sharded across TensorCores; the extra stores hide under the VALU-bound tap math.
    xp_ref[...] = jnp.zeros_like(xp_ref)
    xp_ref[pad:pad + H, pad:pad + W, :] = x_ref[...].astype(jnp.float32)

    # Horizontal (W / sublane axis) pass: unweighted 5-tap box sum and normalized
    # Gaussian 5-tap sum.  Shifts are static slices; the lane axis is never shifted.
    sl = xp_ref[:, 0:W, :]
    box_w = sl
    gau_w = gn[0] * sl
    for j in range(1, K):
        sl = xp_ref[:, j:j + W, :]
        box_w = box_w + sl
        gau_w = gau_w + gn[j] * sl

    # Vertical (H / untiled leading axis) pass:
    #   y[h, w] = sum_i gn[i] * box_w[h+i, w]  +  sum_i gau_w[h+i, w]
    acc = gn[0] * box_w[0:H] + gau_w[0:H]
    for i in range(1, K):
        acc = acc + gn[i] * box_w[i:i + H] + gau_w[i:i + H]

    o_ref[...] = acc.astype(o_ref.dtype)


def _round_up(a, m):
    return (a + m - 1) // m * m


@functools.partial(jax.jit, static_argnames=("kernel_size", "sigma"))
def gaussian_conv(x, *, kernel_size=5, sigma=2.0):
    """x: (N, C, H, W). Depthwise Gaussian blur (zero padding, stride 1), same shape out."""
    N, C, H, W = x.shape
    pad = kernel_size // 2
    Hp, Wp = H + 2 * pad, W + 2 * pad
    itemsize = jnp.dtype(x.dtype).itemsize

    g, s = _gauss_profile(kernel_size, sigma)
    gn = tuple(float(v) for v in (g / s))        # normalized 1-D taps, baked into kernel

    # ---- plane tiling: planes (N*C) live on the 128-lane axis ----------------------
    LANE = 128
    B = N * C
    B128 = _round_up(B, LANE)
    # Size tile_b so one input block is ~2 MiB (double-buffered in+out stays a few MiB),
    # multiple of 128 so stores stay unmasked, capped at 1024 planes per step.
    target_block_bytes = 2 * 1024 * 1024
    cap = max(LANE, min(1024, (target_block_bytes // (H * W * itemsize)) // LANE * LANE))
    tile_b = min(cap, B128)
    Bp = _round_up(B, tile_b)
    num_blocks = Bp // tile_b
    # v7x megacore: keep the parallel grid axis >= 2 when there are at least two
    # 128-lane tiles of real planes to split (v5e/v6e have one TC and are unaffected).
    if num_blocks == 1 and tile_b >= 2 * LANE:
        tile_b = _round_up(tile_b // 2, LANE)
        Bp = _round_up(B, tile_b)
        num_blocks = Bp // tile_b

    # ---- layout plumbing: (N, C, H, W) -> (H, W, Bp), lane-dense --------------------
    xt = jnp.moveaxis(x.reshape(B, H, W), 0, 2)            # (H, W, B)
    xt = jnp.pad(xt, ((0, 0), (0, 0), (0, Bp - B)))        # plane-axis pad only (no spatial pad)

    # ---- VMEM budget: explicit limit so larger blocks compile on every generation ----
    in_blk = H * W * tile_b * itemsize
    out_blk = in_blk
    scr_blk = Hp * _round_up(Wp, 8) * tile_b * 4           # f32 scratch incl. sublane padding
    vmem_limit = int(min(48 * 1024 * 1024,
                         max(32 * 1024 * 1024, 6 * (in_blk + out_blk + scr_blk))))

    kernel_fn = functools.partial(_gauss_conv_kernel, gn=gn, H=H, W=W, pad=pad)

    y = pl.pallas_call(
        kernel_fn,
        out_shape=jax.ShapeDtypeStruct((H, W, Bp), x.dtype),
        grid_spec=pltpu.PrefetchScalarGridSpec(
            num_scalar_prefetch=0,
            grid=(num_blocks,),
            # Last two block dims: W equals the full array dim, tile_b is a multiple
            # of 128 -> (8, 128) rule satisfied; one DMA per block.
            in_specs=[pl.BlockSpec((H, W, tile_b), lambda i: (0, 0, i))],
            out_specs=pl.BlockSpec((H, W, tile_b), lambda i: (0, 0, i)),
            scratch_shapes=[pltpu.VMEM((Hp, Wp, tile_b), jnp.float32)],
        ),
        compiler_params=pltpu.CompilerParams(
            dimension_semantics=("parallel",),
            vmem_limit_bytes=vmem_limit,
        ),
    )(xt)

    # TODO(synk): for large images (one f32 plane >> a few MiB) add an H grid axis with
    # a 2*pad halo (overlapping input blocks) so blocks stay bounded on v7x's 64 MiB VMEM.

    return jnp.moveaxis(y[:, :, :B], 2, 0).reshape(N, C, H, W)


def _reference(x, *, kernel_size=5, sigma=2.0):
    """Independent reference: grouped (depthwise) conv via lax at highest precision."""
    C = x.shape[1]
    kern = jnp.asarray(_gauss_kernel_2d(kernel_size, sigma), jnp.float32)
    w = jnp.broadcast_to(kern[None, None], (C, 1, kernel_size, kernel_size))
    p = kernel_size // 2
    return jax.lax.conv_general_dilated(
        x, w, window_strides=(1, 1), padding=((p, p), (p, p)),
        dimension_numbers=("NCHW", "OIHW", "NCHW"),
        feature_group_count=C,
        precision=jax.lax.Precision.HIGHEST)


if __name__ == "__main__":
    key = jax.random.PRNGKey(0)
    N, C, H, W = 2, 3, 16, 16            # module default channels=3
    x = jax.random.normal(key, (N, C, H, W), dtype=jnp.float32)

    out = jax.block_until_ready(gaussian_conv(x, kernel_size=5, sigma=2.0))
    ref = _reference(x, kernel_size=5, sigma=2.0)

    assert out.shape == (N, C, H, W), out.shape
    max_err = float(jnp.max(jnp.abs(out - ref)))
    assert jnp.allclose(out, ref, rtol=1e-5, atol=1e-5), max_err

    print("KERNEL_OK")
</pallas_src>

<mosaic_0001>
module attributes {stable_mosaic.version = 11 : i64} {
  func.func @_gauss_conv_kernel(%arg0: i32, %arg1: memref<16x16x128xf32, #tpu.memory_space<vmem>>, %arg2: memref<16x16x128xf32, #tpu.memory_space<vmem>>, %arg3: memref<20x20x128xf32, #tpu.memory_space<vmem>>) attributes {dimension_semantics = [#tpu.dimension_semantics<parallel>], iteration_bounds = array<i64: 1>, scalar_prefetch = 0 : i64, scratch_operands = 1 : i64, tpu.core_type = #tpu.core_type<tc>, window_params = [{transform_indices = @transform_0, window_bounds = array<i64: 16, 16, 128>}, {transform_indices = @transform_1, window_bounds = array<i64: 16, 16, 128>}]} {
    %cst = arith.constant 0.000000e+00 : f32
    %0 = vector.broadcast %cst : f32 to vector<20x20x128xf32>
    %c0 = arith.constant 0 : index
    %c0_0 = arith.constant 0 : index
    %c0_1 = arith.constant 0 : index
    %1 = vector.load %arg3[%c0, %c0_0, %c0_1] : memref<20x20x128xf32, #tpu.memory_space<vmem>>, vector<20x20x128xf32>
    tpu.vector_store %arg3[%c0, %c0_0, %c0_1], %0 {strides = array<i32>} : memref<20x20x128xf32, #tpu.memory_space<vmem>>, vector<20x20x128xf32>,
    %c0_2 = arith.constant 0 : index
    %c0_3 = arith.constant 0 : index
    %c0_4 = arith.constant 0 : index
    %2 = vector.load %arg1[%c0_2, %c0_3, %c0_4] : memref<16x16x128xf32, #tpu.memory_space<vmem>>, vector<16x16x128xf32>
    %c2 = arith.constant 2 : index
    %c2_5 = arith.constant 2 : index
    %c0_6 = arith.constant 0 : index
    %3 = vector.load %arg3[%c2, %c2_5, %c0_6] : memref<20x20x128xf32, #tpu.memory_space<vmem>>, vector<16x16x128xf32>
    tpu.vector_store %arg3[%c2, %c2_5, %c0_6], %2 {strides = array<i32>} : memref<20x20x128xf32, #tpu.memory_space<vmem>>, vector<16x16x128xf32>,
    %c0_7 = arith.constant 0 : index
    %c0_8 = arith.constant 0 : index
    %c0_9 = arith.constant 0 : index
    %4 = vector.load %arg3[%c0_7, %c0_8, %c0_9] : memref<20x20x128xf32, #tpu.memory_space<vmem>>, vector<20x16x128xf32>
    %cst_10 = arith.constant 0.011170336 : f32
    %5 = vector.broadcast %cst_10 : f32 to vector<20x16x128xf32>
    %6 = arith.mulf %5, %4 : vector<20x16x128xf32>
    %c0_11 = arith.constant 0 : index
    %c1 = arith.constant 1 : index
    %c0_12 = arith.constant 0 : index
    %7 = vector.load %arg3[%c0_11, %c1, %c0_12] : memref<20x20x128xf32, #tpu.memory_space<vmem>>, vector<20x16x128xf32>
    %8 = arith.addf %4, %7 : vector<20x16x128xf32>
    %cst_13 = arith.constant 0.0236476026 : f32
    %9 = vector.broadcast %cst_13 : f32 to vector<20x16x128xf32>
    %10 = arith.mulf %9, %7 : vector<20x16x128xf32>
    %11 = arith.addf %6, %10 : vector<20x16x128xf32>
    %c0_14 = arith.constant 0 : index
    %c2_15 = arith.constant 2 : index
    %c0_16 = arith.constant 0 : index
    %12 = vector.load %arg3[%c0_14, %c2_15, %c0_16] : memref<20x20x128xf32, #tpu.memory_space<vmem>>, vector<20x16x128xf32>
    %13 = arith.addf %8, %12 : vector<20x16x128xf32>
    %cst_17 = arith.constant 0.0303641222 : f32
    %14 = vector.broadcast %cst_17 : f32 to vector<20x16x128xf32>
    %15 = arith.mulf %14, %12 : vector<20x16x128xf32>
    %16 = arith.addf %11, %15 : vector<20x16x128xf32>
    %c0_18 = arith.constant 0 : index
    %c3 = arith.constant 3 : index
    %c0_19 = arith.constant 0 : index
    %17 = vector.load %arg3[%c0_18, %c3, %c0_19] : memref<20x20x128xf32, #tpu.memory_space<vmem>>, vector<20x16x128xf32>
    %18 = arith.addf %13, %17 : vector<20x16x128xf32>
    %cst_20 = arith.constant 0.0236476026 : f32
    %19 = vector.broadcast %cst_20 : f32 to vector<20x16x128xf32>
    %20 = arith.mulf %19, %17 : vector<20x16x128xf32>
    %21 = arith.addf %16, %20 : vector<20x16x128xf32>
    %c0_21 = arith.constant 0 : index
    %c4 = arith.constant 4 : index
    %c0_22 = arith.constant 0 : index
    %22 = vector.load %arg3[%c0_21, %c4, %c0_22] : memref<20x20x128xf32, #tpu.memory_space<vmem>>, vector<20x16x128xf32>
    %23 = arith.addf %18, %22 : vector<20x16x128xf32>
    %cst_23 = arith.constant 0.011170336 : f32
    %24 = vector.broadcast %cst_23 : f32 to vector<20x16x128xf32>
    %25 = arith.mulf %24, %22 : vector<20x16x128xf32>
    %26 = arith.addf %21, %25 : vector<20x16x128xf32>
    %27 = vector.extract_strided_slice %23 {offsets = [0, 0, 0], sizes = [16, 16, 128], strides = [1, 1, 1]} : vector<20x16x128xf32> to vector<16x16x128xf32>
    %cst_24 = arith.constant 0.011170336 : f32
    %28 = vector.broadcast %cst_24 : f32 to vector<16x16x128xf32>
    %29 = arith.mulf %28, %27 : vector<16x16x128xf32>
    %30 = vector.extract_strided_slice %26 {offsets = [0, 0, 0], sizes = [16, 16, 128], strides = [1, 1, 1]} : vector<20x16x128xf32> to vector<16x16x128xf32>
    %31 = arith.addf %29, %30 : vector<16x16x128xf32>
    %32 = vector.extract_strided_slice %23 {offsets = [1, 0, 0], sizes = [16, 16, 128], strides = [1, 1, 1]} : vector<20x16x128xf32> to vector<16x16x128xf32>
    %cst_25 = arith.constant 0.0236476026 : f32
    %33 = vector.broadcast %cst_25 : f32 to vector<16x16x128xf32>
    %34 = arith.mulf %33, %32 : vector<16x16x128xf32>
    %35 = arith.addf %31, %34 : vector<16x16x128xf32>
    %36 = vector.extract_strided_slice %26 {offsets = [1, 0, 0], sizes = [16, 16, 128], strides = [1, 1, 1]} : vector<20x16x128xf32> to vector<16x16x128xf32>
    %37 = arith.addf %35, %36 : vector<16x16x128xf32>
    %38 = vector.extract_strided_slice %23 {offsets = [2, 0, 0], sizes = [16, 16, 128], strides = [1, 1, 1]} : vector<20x16x128xf32> to vector<16x16x128xf32>
    %cst_26 = arith.constant 0.0303641222 : f32
    %39 = vector.broadcast %cst_26 : f32 to vector<16x16x128xf32>
    %40 = arith.mulf %39, %38 : vector<16x16x128xf32>
    %41 = arith.addf %37, %40 : vector<16x16x128xf32>
    %42 = vector.extract_strided_slice %26 {offsets = [2, 0, 0], sizes = [16, 16, 128], strides = [1, 1, 1]} : vector<20x16x128xf32> to vector<16x16x128xf32>
    %43 = arith.addf %41, %42 : vector<16x16x128xf32>
    %44 = vector.extract_strided_slice %23 {offsets = [3, 0, 0], sizes = [16, 16, 128], strides = [1, 1, 1]} : vector<20x16x128xf32> to vector<16x16x128xf32>
    %cst_27 = arith.constant 0.0236476026 : f32
    %45 = vector.broadcast %cst_27 : f32 to vector<16x16x128xf32>
    %46 = arith.mulf %45, %44 : vector<16x16x128xf32>
    %47 = arith.addf %43, %46 : vector<16x16x128xf32>
    %48 = vector.extract_strided_slice %26 {offsets = [3, 0, 0], sizes = [16, 16, 128], strides = [1, 1, 1]} : vector<20x16x128xf32> to vector<16x16x128xf32>
    %49 = arith.addf %47, %48 : vector<16x16x128xf32>
    %50 = vector.extract_strided_slice %23 {offsets = [4, 0, 0], sizes = [16, 16, 128], strides = [1, 1, 1]} : vector<20x16x128xf32> to vector<16x16x128xf32>
    %cst_28 = arith.constant 0.011170336 : f32
    %51 = vector.broadcast %cst_28 : f32 to vector<16x16x128xf32>
    %52 = arith.mulf %51, %50 : vector<16x16x128xf32>
    %53 = arith.addf %49, %52 : vector<16x16x128xf32>
    %54 = vector.extract_strided_slice %26 {offsets = [4, 0, 0], sizes = [16, 16, 128], strides = [1, 1, 1]} : vector<20x16x128xf32> to vector<16x16x128xf32>
    %55 = arith.addf %53, %54 : vector<16x16x128xf32>
    %c0_29 = arith.constant 0 : index
    %c0_30 = arith.constant 0 : index
    %c0_31 = arith.constant 0 : index
    %56 = vector.load %arg2[%c0_29, %c0_30, %c0_31] : memref<16x16x128xf32, #tpu.memory_space<vmem>>, vector<16x16x128xf32>
    tpu.vector_store %arg2[%c0_29, %c0_30, %c0_31], %55 {strides = array<i32>} : memref<16x16x128xf32, #tpu.memory_space<vmem>>, vector<16x16x128xf32>,
    return
  }
  func.func @transform_0(%arg0: i32) -> (i32, i32, i32) {
    %c0_i32 = arith.constant 0 : i32
    %c0_i32_0 = arith.constant 0 : i32
    %c0_i32_1 = arith.constant 0 : i32
    return %c0_i32, %c0_i32_0, %arg0 : i32, i32, i32
  }
  func.func @transform_1(%arg0: i32) -> (i32, i32, i32) {
    %c0_i32 = arith.constant 0 : i32
    %c0_i32_0 = arith.constant 0 : i32
    %c0_i32_1 = arith.constant 0 : i32
    return %c0_i32, %c0_i32_0, %arg0 : i32, i32, i32
  }
}

</mosaic_0001>

<bundles_post_ra>
// kernel: gaussian_conv.1
= control target key start
LH: loop header
LB: loop body
LE: loop exit
PB: predicated region body
PF: predicated region fallthrough
CT: control target
= control target key end

     0   :  { %v1287_v0 = vmov 0.0   ;;  %s2183_s0 = inlined_call_operand.vmem [shape: f32[16,16,128], index: 0, kind: input, shape index: {}]   ;;  %s2184_s1 = inlined_call_operand.vmem [shape: f32[16,16,128], index: 1, kind: output, shape index: {}]  }
   0x1   :  { %8 = vst [vmem:[#allocation2] sm:$0xff] %v1287_v0  ;;  %9 = vst [vmem:[#allocation2 + $0x8] sm:$0xff] %v1287_v0  ;;  %v1301_v1 = vld [vmem:[%s2183_s0] sm:$0xff]  ;;  %v1306_v2 = vld [vmem:[%s2183_s0 + $0x8] sm:$0xff] }
   0x2   :  { %10 = vst [vmem:[#allocation2 + $0x10] sm:$0xf] %v1287_v0  ;;  %11 = vst [vmem:[#allocation2 + $0x18] sm:$0xff] %v1287_v0  ;;  %v1311_v3 = vld [vmem:[%s2183_s0 + $0x10] sm:$0xff]  ;;  %v1319_v4 = vld [vmem:[%s2183_s0 + $0x18] sm:$0xff] }
   0x3   :  { %12 = vst [vmem:[#allocation2 + $0x20] sm:$0xff] %v1287_v0  ;;  %13 = vst [vmem:[#allocation2 + $0x28] sm:$0xf] %v1287_v0  ;;  %v1324_v5 = vld [vmem:[%s2183_s0 + $0x20] sm:$0xff]  ;;  %v1329_v6 = vld [vmem:[%s2183_s0 + $0x28] sm:$0xff] }
   0x4   :  { %14 = vst [vmem:[#allocation2 + $0x30] sm:$0xff] %v1287_v0  ;;  %15 = vst [vmem:[#allocation2 + $0x38] sm:$0xff] %v1287_v0  ;;  %v1337_v7 = vld [vmem:[%s2183_s0 + $0x30] sm:$0xff]  ;;  %v1342_v8 = vld [vmem:[%s2183_s0 + $0x38] sm:$0xff]  ;;  %v1398_v19 = vmul.f32 0.030364122, %v1301_v1 }
   0x5   :  { %16 = vst [vmem:[#allocation2 + $0x40] sm:$0xf] %v1287_v0  ;;  %17 = vst [vmem:[#allocation2 + $0x48] sm:$0xff] %v1287_v0  ;;  %v1347_v9 = vld [vmem:[%s2183_s0 + $0x40] sm:$0xff]  ;;  %v1355_v10 = vld [vmem:[%s2183_s0 + $0x48] sm:$0xff] }
   0x6   :  { %18 = vst [vmem:[#allocation2 + $0x50] sm:$0xff] %v1287_v0  ;;  %19 = vst [vmem:[#allocation2 + $0x58] sm:$0xf] %v1287_v0  ;;  %v1360_v11 = vld [vmem:[%s2183_s0 + $0x50] sm:$0xff]  ;;  %v1365_v12 = vld [vmem:[%s2183_s0 + $0x58] sm:$0xff] }
   0x7   :  { %20 = vst [vmem:[#allocation2 + $0x60] sm:$0xff] %v1287_v0  ;;  %21 = vst [vmem:[#allocation2 + $0x68] sm:$0xff] %v1287_v0  ;;  %v1373_v13 = vld [vmem:[%s2183_s0 + $0x60] sm:$0xff]  ;;  %v1378_v14 = vld [vmem:[%s2183_s0 + $0x68] sm:$0xff]  ;;  %v1410_v23 = vmul.f32 0.030364122, %v1311_v3 }
   0x8   :  { %22 = vst [vmem:[#allocation2 + $0x70] sm:$0xf] %v1287_v0  ;;  %23 = vst [vmem:[#allocation2 + $0x78] sm:$0xff] %v1287_v0  ;;  %v1383_v15 = vld [vmem:[%s2183_s0 + $0x70] sm:$0xff]  ;;  %v83_v16 = vld [vmem:[%s2183_s0 + $0x78] sm:$0xff] }
   0x9   :  { %24 = vst [vmem:[#allocation2 + $0x80] sm:$0xff] %v1287_v0  ;;  %25 = vst [vmem:[#allocation2 + $0x88] sm:$0xf] %v1287_v0  ;;  %v84_v17 = vld [vmem:[%s2183_s0 + $0x80] sm:$0xff]  ;;  %v85_v18 = vld [vmem:[%s2183_s0 + $0x88] sm:$0xff] }
   0xa   :  { %26 = vst [vmem:[#allocation2 + $0x90] sm:$0xff] %v1287_v0  ;;  %27 = vst [vmem:[#allocation2 + $0x98] sm:$0xff] %v1287_v0  ;;  %v86_v20 = vld [vmem:[%s2183_s0 + $0x90] sm:$0xff]  ;;  %v87_v21 = vld [vmem:[%s2183_s0 + $0x98] sm:$0xff]  ;;  %v1422_v27 = vmul.f32 0.030364122, %v1324_v5 }
   0xb   :  { %28 = vst [vmem:[#allocation2 + $0xa0] sm:$0xf] %v1287_v0  ;;  %29 = vst [vmem:[#allocation2 + $0xa8] sm:$0xff] %v1287_v0  ;;  %v88_v22 = vld [vmem:[%s2183_s0 + $0xa0] sm:$0xff]  ;;  %v89_v24 = vld [vmem:[%s2183_s0 + $0xa8] sm:$0xff] }
   0xc   :  { %30 = vst [vmem:[#allocation2 + $0xb0] sm:$0xff] %v1287_v0  ;;  %31 = vst [vmem:[#allocation2 + $0xb8] sm:$0xf] %v1287_v0  ;;  %v90_v25 = vld [vmem:[%s2183_s0 + $0xb0] sm:$0xff]  ;;  %v91_v26 = vld [vmem:[%s2183_s0 + $0xb8] sm:$0xff] }
   0xd   :  { %32 = vst [vmem:[#allocation2 + $0xc0] sm:$0xff] %v1287_v0  ;;  %33 = vst [vmem:[#allocation2 + $0xc8] sm:$0xff] %v1287_v0  ;;  %v92_v28 = vld [vmem:[%s2183_s0 + $0xc0] sm:$0xff]  ;;  %v93_v29 = vld [vmem:[%s2183_s0 + $0xc8] sm:$0xff]  ;;  %v1434_v31 = vmul.f32 0.030364122, %v1337_v7 }
   0xe   :  { %34 = vst [vmem:[#allocation2 + $0xd0] sm:$0xf] %v1287_v0  ;;  %35 = vst [vmem:[#allocation2 + $0xd8] sm:$0xff] %v1287_v0  ;;  %v94_v30 = vld [vmem:[%s2183_s0 + $0xd0] sm:$0xff]  ;;  %v95_v32 = vld [vmem:[%s2183_s0 + $0xd8] sm:$0xff] }
   0xf   :  { %36 = vst [vmem:[#allocation2 + $0xe0] sm:$0xff] %v1287_v0  ;;  %37 = vst [vmem:[#allocation2 + $0xe8] sm:$0xf] %v1287_v0  ;;  %v96_v33 = vld [vmem:[%s2183_s0 + $0xe0] sm:$0xff]  ;;  %v97_v34 = vld [vmem:[%s2183_s0 + $0xe8] sm:$0xff] }
  0x10   :  { %38 = vst [vmem:[#allocation2 + $0xf0] sm:$0xff] %v1287_v0  ;;  %39 = vst [vmem:[#allocation2 + $0xf8] sm:$0xff] %v1287_v0  ;;  %v1446_v35 = vmul.f32 0.030364122, %v1306_v2  ;;  %v98_v36 = vld [vmem:[%s2183_s0 + $0xf0] sm:$0xff]  ;;  %v99_v37 = vld [vmem:[%s2183_s0 + $0xf8] sm:$0xff] }
  0x11   :  { %40 = vst [vmem:[#allocation2 + $0x100] sm:$0xf] %v1287_v0  ;;  %41 = vst [vmem:[#allocation2 + $0x108] sm:$0xff] %v1287_v0  ;;  %v1455_v39 = vmul.f32 0.030364122, %v1319_v4  ;;  %v213_v48 = vld [vmem:[#allocation2 + $0x1] sm:$0xff] }
  0x12   :  { %42 = vst [vmem:[#allocation2 + $0x110] sm:$0xff] %v1287_v0  ;;  %43 = vst [vmem:[#allocation2 + $0x118] sm:$0xf] %v1287_v0  ;;  %v1458_v42 = vmul.f32 0.030364122, %v1329_v6  ;;  %v215_v49 = vld [vmem:[#allocation2 + $0x19] sm:$0xff] }
  0x13   :  { %44 = vst [vmem:[#allocation2 + $0x120] sm:$0xff] %v1287_v0  ;;  %45 = vst [vmem:[#allocation2 + $0x128] sm:$0xff] %v1287_v0  ;;  %v1461_v43 = vmul.f32 0.030364122, %v1342_v8  ;;  %v293_v54 = vmul.f32 0.023647603, %v213_v48 }
  0x14   :  { %46 = vst [vmem:[#allocation2 + $0x130] sm:$0xf] %v1287_v0  ;;  %47 = vst [vmem:[#allocation2 + $0x138] sm:$0xff] %v1287_v0  ;;  %v295_v57 = vmul.f32 0.023647603, %v215_v49  ;;  %v373_v58 = vld [vmem:[#allocation2 + $0x2] sm:$0xff] }
  0x15   :  { %48 = vst [vmem:[#allocation2 + $0x140] sm:$0xff] %v1287_v0  ;;  %49 = vst [vmem:[#allocation2 + $0x148] sm:$0xf] %v1287_v0 }
  0x16   :  { %50 = vst [vmem:[#allocation2 + $0x150] sm:$0xff] %v1287_v0  ;;  %51 = vst [vmem:[#allocation2 + $0x158] sm:$0xff] %v1287_v0 }
  0x17   :  { %52 = vst [vmem:[#allocation2 + $0x160] sm:$0xf] %v1287_v0  ;;  %53 = vst [vmem:[#allocation2 + $0x168] sm:$0xff] %v1287_v0 }
  0x18   :  { %54 = vst [vmem:[#allocation2 + $0x170] sm:$0xff] %v1287_v0  ;;  %55 = vst [vmem:[#allocation2 + $0x178] sm:$0xf] %v1287_v0 }
  0x19   :  { %56 = vst [vmem:[#allocation2 + $0x180] sm:$0xff] %v1287_v0  ;;  %57 = vst [vmem:[#allocation2 + $0x188] sm:$0xff] %v1287_v0 }
  0x1a   :  { %58 = vst [vmem:[#allocation2 + $0x190] sm:$0xf] %v1287_v0  ;;  %59 = vst [vmem:[#allocation2 + $0x198] sm:$0xff] %v1287_v0 }
  0x1b   :  { %60 = vst [vmem:[#allocation2 + $0x1a0] sm:$0xff] %v1287_v0  ;;  %61 = vst [vmem:[#allocation2 + $0x1a8] sm:$0xf] %v1287_v0 }
  0x1c   :  { %62 = vst [vmem:[#allocation2 + $0x1b0] sm:$0xff] %v1287_v0  ;;  %63 = vst [vmem:[#allocation2 + $0x1b8] sm:$0xff] %v1287_v0 }
  0x1d   :  { %64 = vst [vmem:[#allocation2 + $0x1c0] sm:$0xf] %v1287_v0  ;;  %65 = vst [vmem:[#allocation2 + $0x1c8] sm:$0xff] %v1287_v0 }
  0x1e   :  { %66 = vst [vmem:[#allocation2 + $0x1d0] sm:$0xff] %v1287_v0  ;;  %67 = vst [vmem:[#allocation2 + $0x1d8] sm:$0xf] %v1287_v0 }
  0x1f   :  { %101 = vst [vmem:[#allocation2 + $0x32] sm:$0xff] %v1301_v1  ;;  %102 = vst [vmem:[#allocation2 + $0x3a] sm:$0xff] %v1306_v2 }
  0x20   :  { %103 = vst [vmem:[#allocation2 + $0x4a] sm:$0xff] %v1311_v3  ;;  %104 = vst [vmem:[#allocation2 + $0x52] sm:$0xff] %v1319_v4 }
  0x21   :  { %105 = vst [vmem:[#allocation2 + $0x62] sm:$0xff] %v1324_v5  ;;  %106 = vst [vmem:[#allocation2 + $0x6a] sm:$0xff] %v1329_v6 }
  0x22   :  { %107 = vst [vmem:[#allocation2 + $0x7a] sm:$0xff] %v1337_v7  ;;  %108 = vst [vmem:[#allocation2 + $0x82] sm:$0xff] %v1342_v8 }
  0x23   :  { %109 = vst [vmem:[#allocation2 + $0x92] sm:$0xff] %v1347_v9  ;;  %2193 = vst [vmem:[#allocation3_spill] sm:$0xff] %v1365_v12 }
  0x24   :  { %110 = vst [vmem:[#allocation2 + $0x9a] sm:$0xff] %v1355_v10  ;;  %111 = vst [vmem:[#allocation2 + $0xaa] sm:$0xff] %v1360_v11 }
  0x25   :  { %112 = vst [vmem:[#allocation2 + $0xb2] sm:$0xff] %v1365_v12  ;;  %2194 = vst [vmem:[#allocation4_spill] sm:$0xff] %v1373_v13 }
  0x26   :  { %2195 = vst [vmem:[#allocation5_spill] sm:$0xff] %v1378_v14  ;;  %2196 = vst [vmem:[#allocation6_spill] sm:$0xff] %v1383_v15  ;;  %v137_v38 = vld [vmem:[#allocation2 + $0x30] sm:$0xff] }
  0x27   :  { %113 = vst [vmem:[#allocation2 + $0xc2] sm:$0xff] %v1373_v13  ;;  %114 = vst [vmem:[#allocation2 + $0xca] sm:$0xff] %v1378_v14  ;;  %v139_v40 = vld [vmem:[#allocation2 + $0x48] sm:$0xff]  ;;  %v177_v45 = vmul.f32 0.011170336, %v137_v38  ;;  %v217_v50 = vld [vmem:[#allocation2 + $0x31] sm:$0xff] }
  0x28   :  { %115 = vst [vmem:[#allocation2 + $0xda] sm:$0xff] %v1383_v15  ;;  %116 = vst [vmem:[#allocation2 + $0xe2] sm:$0xff] %v83_v16  ;;  %v141_v41 = vld [vmem:[#allocation2 + $0x60] sm:$0xff]  ;;  %v179_v46 = vmul.f32 0.011170336, %v139_v40  ;;  %v219_v51 = vld [vmem:[#allocation2 + $0x49] sm:$0xff]  ;;  %v257_v56 = vadd.f32 %v217_v50, %v137_v38 }
  0x29   :  { %117 = vst [vmem:[#allocation2 + $0xf2] sm:$0xff] %v84_v17  ;;  %118 = vst [vmem:[#allocation2 + $0xfa] sm:$0xff] %v85_v18  ;;  %v143_v44 = vld [vmem:[#allocation2 + $0x78] sm:$0xff]  ;;  %v181_v47 = vmul.f32 0.011170336, %v141_v41  ;;  %v221_v52 = vld [vmem:[#allocation2 + $0x61] sm:$0xff]  ;;  %v259_v63 = vadd.f32 %v219_v51, %v139_v40 }
  0x2a   :  { %119 = vst [vmem:[#allocation2 + $0x10a] sm:$0xff] %v86_v20  ;;  %120 = vst [vmem:[#allocation2 + $0x112] sm:$0xff] %v87_v21  ;;  %v223_v53 = vld [vmem:[#allocation2 + $0x79] sm:$0xff]  ;;  %v183_v55 = vmul.f32 0.011170336, %v143_v44  ;;  %v261_v59 = vadd.f32 %v221_v52, %v141_v41 }
  0x2b   :  { %121 = vst [vmem:[#allocation2 + $0x122] sm:$0xff] %v88_v22  ;;  %122 = vst [vmem:[#allocation2 + $0x12a] sm:$0xff] %v89_v24  ;;  %v297_v60 = vmul.f32 0.023647603, %v217_v50  ;;  %v299_v61 = vmul.f32 0.023647603, %v219_v51  ;;  %v263_v0 = vadd.f32 %v223_v53, %v143_v44  ;;  %v413_v22 = vadd.f32 %v373_v58, %v213_v48 }
  0x2c   :  { %123 = vst [vmem:[#allocation2 + $0x13a] sm:$0xff] %v90_v25  ;;  %124 = vst [vmem:[#allocation2 + $0x142] sm:$0xff] %v91_v26  ;;  %v301_v62 = vmul.f32 0.023647603, %v221_v52  ;;  %v303_v16 = vmul.f32 0.023647603, %v223_v53  ;;  %v417_v26 = vadd.f32 %v257_v56, %v1301_v1 }
  0x2d   :  { %125 = vst [vmem:[#allocation2 + $0x152] sm:$0xff] %v92_v28  ;;  %126 = vst [vmem:[#allocation2 + $0x15a] sm:$0xff] %v93_v29  ;;  %v375_v17 = vld [vmem:[#allocation2 + $0x1a] sm:$0xff]  ;;  %v1464_v18 = vmul.f32 0.030364122, %v1347_v9  ;;  %v337_v20 = vadd.f32 %v297_v60, %v177_v45  ;;  %v339_v21 = vadd.f32 %v299_v61, %v179_v46  ;;  %v421_v29 = vadd.f32 %v261_v59, %v1324_v5  ;;  %v541_v45 = vld [vmem:[#allocation2 + $0x63] sm:$0xff] }
  0x2e   :  { %127 = vst [vmem:[#allocation2 + $0x16a] sm:$0xff] %v94_v30  ;;  %128 = vst [vmem:[#allocation2 + $0x172] sm:$0xff] %v95_v32  ;;  %v341_v24 = vadd.f32 %v301_v62, %v181_v47  ;;  %v343_v25 = vadd.f32 %v303_v16, %v183_v55  ;;  %v415_v28 = vadd.f32 %v375_v17, %v215_v49  ;;  %v453_v30 = vmul.f32 0.030364122, %v373_v58  ;;  %v535_v5 = vld [vmem:[#allocation2 + $0x1b] sm:$0xff]  ;;  %v539_v48 = vld [vmem:[#allocation2 + $0x4b] sm:$0xff] }
  0x2f   :  { %129 = vst [vmem:[#allocation2 + $0x182] sm:$0xff] %v96_v33  ;;  %130 = vst [vmem:[#allocation2 + $0x18a] sm:$0xff] %v97_v34  ;;  %v455_v32 = vmul.f32 0.030364122, %v375_v17  ;;  %v419_v33 = vadd.f32 %v259_v63, %v1311_v3  ;;  %v423_v34 = vadd.f32 %v263_v0, %v1337_v7  ;;  %v1471_v38 = vmul.f32 0.030364122, %v1355_v10 }
  0x30   :  { %131 = vst [vmem:[#allocation2 + $0x19a] sm:$0xff] %v98_v36  ;;  %132 = vst [vmem:[#allocation2 + $0x1a2] sm:$0xff] %v99_v37  ;;  %v533_v36 = vld [vmem:[#allocation2 + $0x3] sm:$0xff]  ;;  %v537_v37 = vld [vmem:[#allocation2 + $0x33] sm:$0xff]  ;;  %v1474_v40 = vmul.f32 0.030364122, %v1360_v11  ;;  %v493_v41 = vadd.f32 %v453_v30, %v293_v54  ;;  %v497_v1 = vadd.f32 %v1398_v19, %v337_v20  ;;  %v499_v44 = vadd.f32 %v1410_v23, %v339_v21 }
  0x31   :  { %v573_v46 = vadd.f32 %v533_v36, %v413_v22  ;;  %v495_v47 = vadd.f32 %v455_v32, %v295_v57  ;;  %v501_v3 = vadd.f32 %v1422_v27, %v341_v24  ;;  %v503_v7 = vadd.f32 %v1434_v31, %v343_v25  ;;  %v543_v50 = vld [vmem:[#allocation2 + $0x7b] sm:$0xff]  ;;  %v693_v23 = vld [vmem:[#allocation2 + $0x4] sm:$0xff]  ;;  %v699_v20 = vld [vmem:[#allocation2 + $0x4c] sm:$0xff] }
  0x32   :  { %2197 = vst [vmem:[#allocation7_spill] sm:$0xff] %v1474_v40  ;;  %v577_v49 = vadd.f32 %v537_v37, %v417_v26  ;;  %v575_v51 = vadd.f32 %v535_v5, %v415_v28  ;;  %v581_v52 = vadd.f32 %v541_v45, %v421_v29  ;;  %v613_v53 = vmul.f32 0.023647603, %v533_v36  ;;  %v697_v59 = vld [vmem:[#allocation2 + $0x34] sm:$0xff]  ;;  %v701_v62 = vld [vmem:[#allocation2 + $0x64] sm:$0xff]  ;;  %v695_v16 = vld [vmem:[#allocation2 + $0x1c] sm:$0xff] }
  0x33   :  { %v617_v55 = vmul.f32 0.023647603, %v537_v37  ;;  %v579_v54 = vadd.f32 %v539_v48, %v419_v33  ;;  %v583_v56 = vadd.f32 %v543_v50, %v423_v34  ;;  %v615_v19 = vmul.f32 0.023647603, %v535_v5  ;;  %v703_v29 = vld [vmem:[#allocation2 + $0x7c] sm:$0xff] }
  0x34   :  { %v621_v58 = vmul.f32 0.023647603, %v541_v45  ;;  %v619_v60 = vmul.f32 0.023647603, %v539_v48  ;;  %v653_v61 = vadd.f32 %v613_v53, %v493_v41  ;;  %v733_v27 = vadd.f32 %v693_v23, %v573_v46  ;;  %v138_v41 = vld [vmem:[#allocation2 + $0x38] sm:$0xff]  ;;  %v216_v5 = vld [vmem:[#allocation2 + $0x21] sm:$0xff] }
  0x35   :  { %v657_v57 = vadd.f32 %v617_v55, %v497_v1  ;;  %v623_v63 = vmul.f32 0.023647603, %v543_v50  ;;  %v655_v31 = vadd.f32 %v615_v19, %v495_v47  ;;  %v1480_v17 = vadd.f32 %v697_v59, %v577_v49  ;;  %v214_v1 = vld [vmem:[#allocation2 + $0x9] sm:$0xff]  ;;  %v144_v55 = vld [vmem:[#allocation2 + $0x80] sm:$0xff] }
  0x36   :  { %v661_v0 = vadd.f32 %v621_v58, %v501_v3  ;;  %v1482_v21 = vadd.f32 %v695_v16, %v575_v51  ;;  %v1484_v22 = vadd.f32 %v701_v62, %v581_v52  ;;  %v773_v24 = vmul.f32 0.011170336, %v693_v23  ;;  %v140_v3 = vld [vmem:[#allocation2 + $0x50] sm:$0xff]  ;;  %v142_v53 = vld [vmem:[#allocation2 + $0x68] sm:$0xff] }
  0x37   :  { %v777_v25 = vmul.f32 0.011170336, %v697_v59  ;;  %v659_v26 = vadd.f32 %v619_v60, %v499_v44  ;;  %v663_v28 = vadd.f32 %v623_v63, %v503_v7  ;;  %v1486_v30 = vadd.f32 %v699_v20, %v579_v54  ;;  %v218_v54 = vld [vmem:[#allocation2 + $0x39] sm:$0xff]  ;;  %v220_v59 = vld [vmem:[#allocation2 + $0x51] sm:$0xff]  ;;  %v222_v60 = vld [vmem:[#allocation2 + $0x69] sm:$0xff] }
  0x38   :  { %v781_v32 = vmul.f32 0.011170336, %v701_v62  ;;  %v1488_v33 = vadd.f32 %v703_v29, %v583_v56  ;;  %v813_v34 = vadd.f32 %v773_v24, %v653_v61  ;;  %v853_v37 = vmul.f32 0.011170336, %v733_v27  ;;  %v224_v61 = vld [vmem:[#allocation2 + $0x81] sm:$0xff] }
  0x39   :  { %v1490_v36 = vadd.f32 %v777_v25, %v657_v57  ;;  %v775_v45 = vmul.f32 0.011170336, %v695_v16  ;;  %v779_v46 = vmul.f32 0.011170336, %v699_v20  ;;  %v857_v44 = vmul.f32 0.011170336, %v1480_v17 }
  0x3a   :  { %v1492_v47 = vadd.f32 %v781_v32, %v661_v0  ;;  %v783_v7 = vmul.f32 0.011170336, %v703_v29  ;;  %v861_v48 = vmul.f32 0.011170336, %v1484_v22  ;;  %v885_v49 = vadd.f32 %v853_v37, %v813_v34 }
  0x3b   :  { %v917_v50 = vmul.f32 0.023647603, %v1482_v21  ;;  %v1497_v51 = vadd.f32 %v775_v45, %v655_v31  ;;  %v1499_v52 = vadd.f32 %v779_v46, %v659_v26  ;;  %v889_v19 = vadd.f32 %v857_v44, %v1490_v36  ;;  %v374_v31 = vld [vmem:[#allocation2 + $0xa] sm:$0xff] }
  0x3c   :  { %v1501_v56 = vadd.f32 %v783_v7, %v663_v28  ;;  %v921_v58 = vmul.f32 0.023647603, %v1486_v30  ;;  %v893_v57 = vadd.f32 %v861_v48, %v1492_v47  ;;  %v1507_v62 = vmul.f32 0.023647603, %v1488_v33 }
  0x3d   :  { %v949_v23 = vadd.f32 %v917_v50, %v885_v49  ;;  %v1013_v27 = vmul.f32 0.030364122, %v1480_v17  ;;  %v178_v63 = vmul.f32 0.011170336, %v138_v41  ;;  %v180_v16 = vmul.f32 0.011170336, %v140_v3 }
  0x3e   :  { %v182_v20 = vmul.f32 0.011170336, %v142_v53  ;;  %v184_v24 = vmul.f32 0.011170336, %v144_v55  ;;  %v258_v25 = vadd.f32 %v218_v54, %v138_v41  ;;  %v294_v26 = vmul.f32 0.023647603, %v214_v1 }
  0x3f   :  { %v981_v0 = vadd.f32 %v949_v23, %v1497_v51  ;;  %v296_v28 = vmul.f32 0.023647603, %v216_v5  ;;  %v298_v29 = vmul.f32 0.023647603, %v218_v54  ;;  %v260_v34 = vadd.f32 %v220_v59, %v140_v3  ;;  %v376_v50 = vld [vmem:[#allocation2 + $0x22] sm:$0xff] }
  0x40   :  { %v300_v37 = vmul.f32 0.023647603, %v220_v59  ;;  %v302_v45 = vmul.f32 0.023647603, %v222_v60  ;;  %v957_v46 = vadd.f32 %v1507_v62, %v893_v57  ;;  %v262_v44 = vadd.f32 %v222_v60, %v142_v53  ;;  %v534_v57 = vld [vmem:[#allocation2 + $0xb] sm:$0xff] }
  0x41   :  { %v1045_v32 = vadd.f32 %v1013_v27, %v981_v0  ;;  %v264_v7 = vadd.f32 %v224_v61, %v144_v55  ;;  %v304_v49 = vmul.f32 0.023647603, %v224_v61  ;;  %v338_v23 = vadd.f32 %v298_v29, %v178_v63 }
  0x42   :  { %v414_v14 = vadd.f32 %v374_v31, %v214_v1  ;;  %v340_v13 = vadd.f32 %v300_v37, %v180_v16  ;;  %v342_v12 = vadd.f32 %v302_v45, %v182_v20  ;;  %v418_v54 = vadd.f32 %v258_v25, %v1306_v2  ;;  %v540_v20 = vld [vmem:[#allocation2 + $0x53] sm:$0xff]  ;;  %v544_v25 = vld [vmem:[#allocation2 + $0x83] sm:$0xff] }
  0x43   :  { %v1077_v15 = vadd.f32 %v1045_v32, %v1490_v36  ;;  %v344_v41 = vadd.f32 %v304_v49, %v184_v24  ;;  %v454_v27 = vmul.f32 0.030364122, %v374_v31  ;;  %v456_v3 = vmul.f32 0.030364122, %v376_v50  ;;  %v542_v24 = vld [vmem:[#allocation2 + $0x6b] sm:$0xff] }
  0x44   :  { %v1514_v59 = vadd.f32 %v921_v58, %v889_v19  ;;  %v416_v0 = vadd.f32 %v376_v50, %v216_v5  ;;  %v420_v53 = vadd.f32 %v260_v34, %v1319_v4  ;;  %v422_v55 = vadd.f32 %v262_v44, %v1329_v6  ;;  %v536_v5 = vld [vmem:[#allocation2 + $0x23] sm:$0xff]  ;;  %v145_v49 = vld [vmem:[#allocation2 + $0x90] sm:$0xff] }
  0x45   :  { %v1113_v40 = vadd.f32 %v1077_v15, %v921_v58  ;;  %v1519_v60 = vadd.f32 %v957_v46, %v1501_v56  ;;  %v424_v61 = vadd.f32 %v264_v7, %v1342_v8  ;;  %v498_v15 = vadd.f32 %v1446_v35, %v338_v23  ;;  %v538_v58 = vld [vmem:[#allocation2 + $0x3b] sm:$0xff]  ;;  %v696_v44 = vld [vmem:[#allocation2 + $0x24] sm:$0xff]  ;;  %v225_v50 = vld [vmem:[#allocation2 + $0x91] sm:$0xff] }
  0x46   :  { %v494_v2 = vadd.f32 %v454_v27, %v294_v26  ;;  %v500_v63 = vadd.f32 %v1455_v39, %v340_v13  ;;  %v502_v19 = vadd.f32 %v1458_v42, %v342_v12  ;;  %v574_v4 = vadd.f32 %v534_v57, %v414_v14  ;;  %v694_v42 = vld [vmem:[#allocation2 + $0xc] sm:$0xff] }
  0x47   :  { %v1145_v1 = vadd.f32 %v1113_v40, %v1499_v52  ;;  %v496_v6 = vadd.f32 %v456_v3, %v296_v28  ;;  %v504_v16 = vadd.f32 %v1461_v43, %v344_v41  ;;  %v578_v40 = vadd.f32 %v538_v58, %v418_v54  ;;  %v698_v28 = vld [vmem:[#allocation2 + $0x3c] sm:$0xff]  ;;  %v700_v54 = vld [vmem:[#allocation2 + $0x54] sm:$0xff]  ;;  %v702_v27 = vld [vmem:[#allocation2 + $0x6c] sm:$0xff] }
  0x48   :  { %v576_v8 = vadd.f32 %v536_v5, %v416_v0  ;;  %v580_v29 = vadd.f32 %v540_v20, %v420_v53  ;;  %v582_v35 = vadd.f32 %v542_v24, %v422_v55  ;;  %v614_v32 = vmul.f32 0.023647603, %v534_v57  ;;  %v704_v55 = vld [vmem:[#allocation2 + $0x84] sm:$0xff] }
  0x49   :  { %v1185_v31 = vadd.f32 %v1145_v1, %v861_v48  ;;  %v584_v13 = vadd.f32 %v544_v25, %v424_v61  ;;  %v616_v39 = vmul.f32 0.023647603, %v536_v5  ;;  %v618_v12 = vmul.f32 0.023647603, %v538_v58 }
  0x4a   :  { %v620_v34 = vmul.f32 0.023647603, %v540_v20  ;;  %v622_v14 = vmul.f32 0.023647603, %v542_v24  ;;  %v654_v48 = vadd.f32 %v614_v32, %v494_v2  ;;  %v734_v37 = vadd.f32 %v694_v42, %v574_v4 }
  0x4b   :  { %v1217_v26 = vadd.f32 %v1185_v31, %v1492_v47  ;;  %v624_v43 = vmul.f32 0.023647603, %v544_v25  ;;  %v656_v45 = vadd.f32 %v616_v39, %v496_v6  ;;  %v658_v46 = vadd.f32 %v618_v12, %v498_v15  ;;  %v545_v12 = vld [vmem:[#allocation2 + $0x93] sm:$0xff] }
  0x4c   :  { %v1531_v7 = vadd.f32 %v698_v28, %v578_v40  ;;  %v660_v23 = vadd.f32 %v620_v34, %v500_v63  ;;  %v662_v41 = vadd.f32 %v622_v14, %v502_v19  ;;  %v1533_v3 = vadd.f32 %v696_v44, %v576_v8 }
  0x4d   :  { %1249 = vst [vmem:[%s2184_s1] sm:$0xff] %v1217_v26  ;;  %v774_v0 = vmul.f32 0.011170336, %v694_v42  ;;  %v664_v53 = vadd.f32 %v624_v43, %v504_v16  ;;  %v1535_v1 = vadd.f32 %v700_v54, %v580_v29  ;;  %v1537_v61 = vadd.f32 %v702_v27, %v582_v35 }
  0x4e   :  { %v778_v57 = vmul.f32 0.011170336, %v698_v28  ;;  %v776_v15 = vmul.f32 0.011170336, %v696_v44  ;;  %v854_v5 = vmul.f32 0.011170336, %v734_v37  ;;  %v265_v58 = vadd.f32 %v225_v50, %v145_v49 }
  0x4f   :  { %v814_v2 = vadd.f32 %v774_v0, %v654_v48  ;;  %v780_v4 = vmul.f32 0.011170336, %v700_v54  ;;  %v782_v31 = vmul.f32 0.011170336, %v702_v27  ;;  %v858_v19 = vmul.f32 0.011170336, %v1531_v7 }
  0x50   :  { %v1539_v63 = vadd.f32 %v778_v57, %v658_v46  ;;  %v1542_v6 = vadd.f32 %v704_v55, %v584_v13  ;;  %v784_v20 = vmul.f32 0.011170336, %v704_v55  ;;  %v918_v24 = vmul.f32 0.023647603, %v1533_v3  ;;  %v146_v54 = vld [vmem:[#allocation2 + $0x98] sm:$0xff] }
  0x51   :  { %v886_v16 = vadd.f32 %v854_v5, %v814_v2  ;;  %v816_v40 = vadd.f32 %v776_v15, %v656_v45  ;;  %v1545_v25 = vadd.f32 %v780_v4, %v660_v23  ;;  %v1547_v8 = vadd.f32 %v782_v31, %v662_v41  ;;  %v705_v45 = vld [vmem:[#allocation2 + $0x94] sm:$0xff] }
  0x52   :  { %v185_v29 = vmul.f32 0.011170336, %v145_v49  ;;  %v1549_v35 = vadd.f32 %v784_v20, %v664_v53  ;;  %v305_v26 = vmul.f32 0.023647603, %v225_v50  ;;  %v425_v39 = vadd.f32 %v265_v58, %v1347_v9  ;;  %v226_v27 = vld [vmem:[#allocation2 + $0x99] sm:$0xff] }
  0x53   :  { %v950_v32 = vadd.f32 %v918_v24, %v886_v16  ;;  %v862_v13 = vmul.f32 0.011170336, %v1537_v61  ;;  %v890_v42 = vadd.f32 %v858_v19, %v1539_v63  ;;  %v922_v34 = vmul.f32 0.023647603, %v1535_v1  ;;  %v546_v24 = vld [vmem:[#allocation2 + $0x9b] sm:$0xff] }
  0x54   :  { %v855_v14 = vmul.f32 0.011170336, %v1482_v21  ;;  %v1014_v28 = vmul.f32 0.030364122, %v1531_v7  ;;  %v345_v37 = vadd.f32 %v305_v26, %v185_v29  ;;  %v585_v43 = vadd.f32 %v545_v12, %v425_v39 }
  0x55   :  { %v982_v48 = vadd.f32 %v950_v32, %v816_v40  ;;  %v1558_v46 = vmul.f32 0.023647603, %v1542_v6  ;;  %v863_v9 = vmul.f32 0.011170336, %v1488_v33  ;;  %v919_v49 = vmul.f32 0.023647603, %v1480_v17 }
  0x56   :  { %v887_v44 = vadd.f32 %v855_v14, %v1497_v51  ;;  %v505_v23 = vadd.f32 %v1464_v18, %v345_v37  ;;  %v625_v41 = vmul.f32 0.023647603, %v545_v12  ;;  %v1564_v21 = vadd.f32 %v705_v45, %v585_v43 }
  0x57   :  { %v1046_v50 = vadd.f32 %v1014_v28, %v982_v48  ;;  %v894_v0 = vadd.f32 %v862_v13, %v1547_v8  ;;  %v1567_v53 = vadd.f32 %v922_v34, %v890_v42  ;;  %v895_v55 = vadd.f32 %v863_v9, %v1501_v56 }
  0x58   :  { %v951_v57 = vadd.f32 %v919_v49, %v887_v44  ;;  %v665_v51 = vadd.f32 %v625_v41, %v505_v23  ;;  %v785_v2 = vmul.f32 0.011170336, %v705_v45  ;;  %v1572_v17 = vmul.f32 0.023647603, %v1564_v21  ;;  %v706_v45 = vld [vmem:[#allocation2 + $0x9c] sm:$0xff]  ;;  %v147_v49 = vld [vmem:[#allocation2 + $0xa8] sm:$0xff] }
  0x59   :  { %v1078_v15 = vadd.f32 %v1046_v50, %v1539_v63  ;;  %v1015_v5 = vmul.f32 0.030364122, %v1486_v30  ;;  %v186_v58 = vmul.f32 0.011170336, %v146_v54  ;;  %v266_v4 = vadd.f32 %v226_v27, %v146_v54  ;;  %v227_v54 = vld [vmem:[#allocation2 + $0xa9] sm:$0xff] }
  0x5a   :  { %v983_v18 = vadd.f32 %v951_v57, %v1490_v36  ;;  %v1576_v19 = vadd.f32 %v785_v2, %v665_v51  ;;  %v959_v20 = vadd.f32 %v1572_v17, %v895_v55  ;;  %v306_v16 = vmul.f32 0.023647603, %v226_v27 }
  0x5b   :  { %v1114_v31 = vadd.f32 %v1078_v15, %v922_v34  ;;  %v859_v29 = vmul.f32 0.011170336, %v1486_v30  ;;  %v1581_v32 = vmul.f32 0.023647603, %v1484_v22  ;;  %v426_v39 = vadd.f32 %v266_v4, %v1355_v10 }
  0x5c   :  { %v1047_v26 = vadd.f32 %v1015_v5, %v983_v18  ;;  %v1586_v12 = vadd.f32 %v959_v20, %v1576_v19  ;;  %v346_v42 = vadd.f32 %v306_v16, %v186_v58  ;;  %v856_v34 = vmul.f32 0.011170336, %v1533_v3 }
  0x5d   :  { %v1146_v36 = vadd.f32 %v1114_v31, %v1545_v25  ;;  %v586_v48 = vadd.f32 %v546_v24, %v426_v39  ;;  %v626_v28 = vmul.f32 0.023647603, %v546_v24  ;;  %v1591_v30 = vmul.f32 0.011170336, %v1542_v6  ;;  %v148_v39 = vld [vmem:[#allocation2 + $0xb0] sm:$0xff] }
  0x5e   :  { %v1079_v14 = vadd.f32 %v1047_v26, %v1499_v52  ;;  %v506_v43 = vadd.f32 %v1471_v38, %v346_v42  ;;  %v888_v10 = vadd.f32 %v856_v34, %v816_v40  ;;  %v920_v44 = vmul.f32 0.023647603, %v1531_v7 }
  0x5f   :  { %v1186_v37 = vadd.f32 %v1146_v36, %v862_v13  ;;  %v958_v50 = vadd.f32 %v1558_v46, %v894_v0  ;;  %v1597_v3 = vadd.f32 %v706_v45, %v586_v48  ;;  %v896_v41 = vadd.f32 %v1591_v30, %v1549_v35  ;;  %v547_v36 = vld [vmem:[#allocation2 + $0xab] sm:$0xff] }
  0x60   :  { %v1115_v23 = vadd.f32 %v1079_v14, %v1581_v32  ;;  %v666_v13 = vadd.f32 %v626_v28, %v506_v43  ;;  %v860_v38 = vmul.f32 0.011170336, %v1535_v1  ;;  %v952_v55 = vadd.f32 %v920_v44, %v888_v10 }
  0x61   :  { %v1218_v27 = vadd.f32 %v1186_v37, %v1547_v8  ;;  %v786_v7 = vmul.f32 0.011170336, %v706_v45  ;;  %v1605_v57 = vmul.f32 0.023647603, %v1597_v3  ;;  %v187_v0 = vmul.f32 0.011170336, %v147_v49 }
  0x62   :  { %v1147_v40 = vadd.f32 %v1115_v23, %v1492_v47  ;;  %v891_v15 = vadd.f32 %v859_v29, %v1499_v52  ;;  %v984_v51 = vadd.f32 %v952_v55, %v1539_v63  ;;  %v1016_v2 = vmul.f32 0.030364122, %v1535_v1  ;;  %v228_v29 = vld [vmem:[#allocation2 + $0xb1] sm:$0xff] }
  0x63   :  { %1250 = vst [vmem:[%s2184_s1 + $0x8] sm:$0xff] %v1218_v27  ;;  %v267_v18 = vadd.f32 %v227_v54, %v147_v49  ;;  %v1613_v58 = vadd.f32 %v786_v7, %v666_v13  ;;  %v960_v4 = vadd.f32 %v1605_v57, %v896_v41  ;;  %v307_v31 = vmul.f32 0.023647603, %v227_v54  ;;  %v707_v49 = vld [vmem:[#allocation2 + $0xac] sm:$0xff] }
  0x64   :  { %v1187_v5 = vadd.f32 %v1147_v40, %v863_v9  ;;  %v892_v20 = vadd.f32 %v860_v38, %v1545_v25  ;;  %v924_v16 = vmul.f32 0.023647603, %v1537_v61  ;;  %v1048_v24 = vadd.f32 %v1016_v2, %v984_v51  ;;  %v548_v7 = vld [vmem:[#allocation2 + $0xb3] sm:$0xff] }
  0x65   :  { %v427_v26 = vadd.f32 %v267_v18, %v1360_v11  ;;  %v1621_v1 = vadd.f32 %v960_v4, %v1613_v58  ;;  %v347_v9 = vadd.f32 %v307_v31, %v187_v0  ;;  %v985_v42 = vadd.f32 %v1514_v59, %v1499_v52  ;;  %v2198_v11 = vld [vmem:[#allocation7_spill] sm:$0xff] }
  0x66   :  { %v1219_v63 = vadd.f32 %v1187_v5, %v1501_v56  ;;  %v1080_v34 = vadd.f32 %v1048_v24, %v1545_v25  ;;  %v865_v48 = vmul.f32 0.011170336, %v1564_v21  ;;  %v1017_v28 = vmul.f32 0.030364122, %v1484_v22  ;;  %v2199_v22 = vld [vmem:[#allocation3_spill] sm:$0xff]  ;;  %v708_v24 = vld [vmem:[#allocation2 + $0xb4] sm:$0xff] }
  0x67   :  { %v587_v14 = vadd.f32 %v547_v36, %v427_v26  ;;  %v507_v37 = vadd.f32 %v2198_v11, %v347_v9  ;;  %v188_v43 = vmul.f32 0.011170336, %v148_v39  ;;  %v268_v45 = vadd.f32 %v228_v29, %v148_v39  ;;  %v149_v5 = vld [vmem:[#allocation2 + $0xc0] sm:$0xff] }
  0x68   :  { %1251 = vst [vmem:[%s2184_s1 + $0x10] sm:$0xff] %v1219_v63  ;;  %v308_v10 = vmul.f32 0.023647603, %v228_v29  ;;  %v1633_v44 = vadd.f32 %v958_v50, %v1549_v35  ;;  %v1116_v52 = vadd.f32 %v1080_v34, %v924_v16  ;;  %v627_v59 = vmul.f32 0.023647603, %v547_v36 }
  0x69   :  { %v1049_v23 = vadd.f32 %v1017_v28, %v985_v42  ;;  %v1635_v41 = vadd.f32 %v707_v49, %v587_v14  ;;  %v428_v27 = vadd.f32 %v268_v45, %v2199_v22  ;;  %v468_v13 = vmul.f32 0.030364122, %v2199_v22  ;;  %v549_v22 = vld [vmem:[#allocation2 + $0xc3] sm:$0xff] }
  0x6a   :  { %v348_v54 = vadd.f32 %v308_v10, %v188_v43  ;;  %v955_v38 = vadd.f32 %v1581_v32, %v891_v15  ;;  %v1640_v55 = vadd.f32 %v924_v16, %v892_v20  ;;  %v1148_v40 = vadd.f32 %v1116_v52, %v1547_v8  ;;  %v229_v20 = vld [vmem:[#allocation2 + $0xc1] sm:$0xff] }
  0x6b   :  { %v1081_v50 = vadd.f32 %v1049_v23, %v1492_v47  ;;  %v667_v0 = vadd.f32 %v627_v59, %v507_v37  ;;  %v787_v51 = vmul.f32 0.011170336, %v707_v49  ;;  %v897_v2 = vadd.f32 %v865_v48, %v1576_v19  ;;  %v2200_v43 = vld [vmem:[#allocation4_spill] sm:$0xff] }
  0x6c   :  { %v588_v18 = vadd.f32 %v548_v7, %v428_v27  ;;  %v1188_v4 = vadd.f32 %v1148_v40, %v1591_v30  ;;  %v866_v32 = vmul.f32 0.011170336, %v1597_v3  ;;  %v986_v15 = vadd.f32 %v1567_v53, %v1545_v25  ;;  %v150_v52 = vld [vmem:[#allocation2 + $0xc8] sm:$0xff] }
  0x6d   :  { %v1117_v31 = vadd.f32 %v1081_v50, %v1507_v62  ;;  %v1651_v16 = vmul.f32 0.023647603, %v1635_v41  ;;  %v508_v26 = vadd.f32 %v468_v13, %v348_v54  ;;  %v628_v39 = vmul.f32 0.023647603, %v548_v7  ;;  %v230_v59 = vld [vmem:[#allocation2 + $0xc9] sm:$0xff] }
  0x6e   :  { %v1018_v29 = vmul.f32 0.030364122, %v1537_v61  ;;  %v1220_v63 = vadd.f32 %v1188_v4, %v1549_v35  ;;  %v1656_v9 = vadd.f32 %v708_v24, %v588_v18  ;;  %v189_v62 = vmul.f32 0.011170336, %v149_v5  ;;  %v709_v18 = vld [vmem:[#allocation2 + $0xc4] sm:$0xff] }
  0x6f   :  { %v1149_v30 = vadd.f32 %v1117_v31, %v1501_v56  ;;  %v961_v36 = vadd.f32 %v1651_v16, %v897_v2  ;;  %v788_v42 = vmul.f32 0.011170336, %v708_v24  ;;  %v269_v25 = vadd.f32 %v229_v20, %v149_v5  ;;  %v2201_v24 = vld [vmem:[#allocation5_spill] sm:$0xff] }
  0x70   :  { %v1050_v34 = vadd.f32 %v1018_v29, %v986_v15  ;;  %1252 = vst [vmem:[%s2184_s1 + $0x18] sm:$0xff] %v1220_v63  ;;  %v1662_v53 = vadd.f32 %v787_v51, %v667_v0  ;;  %v898_v61 = vadd.f32 %v866_v32, %v1613_v58  ;;  %v309_v28 = vmul.f32 0.023647603, %v229_v20  ;;  %v550_v63 = vld [vmem:[#allocation2 + $0xcb] sm:$0xff] }
  0x71   :  { %v1189_v14 = vadd.f32 %v1149_v30, %v865_v48  ;;  %v668_v11 = vadd.f32 %v628_v39, %v508_v26  ;;  %v429_v45 = vadd.f32 %v269_v25, %v2200_v43  ;;  %v469_v10 = vmul.f32 0.030364122, %v2200_v43 }
  0x72   :  { %v1082_v37 = vadd.f32 %v1050_v34, %v1547_v8  ;;  %v1670_v23 = vmul.f32 0.023647603, %v1656_v9  ;;  %v349_v54 = vadd.f32 %v309_v28, %v189_v62  ;;  %v987_v48 = vadd.f32 %v955_v38, %v1492_v47  ;;  %v151_v34 = vld [vmem:[#allocation2 + $0xd8] sm:$0xff] }
  0x73   :  { %v1221_v49 = vadd.f32 %v1189_v14, %v1576_v19  ;;  %v1674_v27 = vadd.f32 %v961_v36, %v1662_v53  ;;  %v589_v40 = vadd.f32 %v549_v22, %v429_v45  ;;  %v1019_v50 = vmul.f32 0.030364122, %v1488_v33  ;;  %v231_v28 = vld [vmem:[#allocation2 + $0xd9] sm:$0xff] }
  0x74   :  { %v1118_v13 = vadd.f32 %v1082_v37, %v1558_v46  ;;  %v962_v7 = vadd.f32 %v1670_v23, %v898_v61  ;;  %v867_v0 = vmul.f32 0.011170336, %v1635_v41  ;;  %v190_v51 = vmul.f32 0.011170336, %v150_v52 }
  0x75   :  { %1253 = vst [vmem:[%s2184_s1 + $0x20] sm:$0xff] %v1221_v49  ;;  %v270_v2 = vadd.f32 %v230_v59, %v150_v52  ;;  %v509_v38 = vadd.f32 %v469_v10, %v349_v54  ;;  %v1051_v5 = vadd.f32 %v1019_v50, %v987_v48  ;;  %v310_v4 = vmul.f32 0.023647603, %v230_v59 }
  0x76   :  { %v1150_v47 = vadd.f32 %v1118_v13, %v1549_v35  ;;  %v1684_v46 = vadd.f32 %v788_v42, %v668_v11  ;;  %v629_v31 = vmul.f32 0.023647603, %v549_v22  ;;  %v1686_v33 = vadd.f32 %v709_v18, %v589_v40 }
  0x77   :  { %v430_v15 = vadd.f32 %v270_v2, %v2201_v24  ;;  %v1083_v26 = vadd.f32 %v1051_v5, %v1501_v56  ;;  %v350_v39 = vadd.f32 %v310_v4, %v190_v51  ;;  %v470_v29 = vmul.f32 0.030364122, %v2201_v24  ;;  %v710_v56 = vld [vmem:[#allocation2 + $0xcc] sm:$0xff] }
  0x78   :  { %v1190_v20 = vadd.f32 %v1150_v47, %v866_v32  ;;  %v1692_v30 = vadd.f32 %v962_v7, %v1684_v46  ;;  %v789_v62 = vmul.f32 0.011170336, %v709_v18  ;;  %v868_v42 = vmul.f32 0.011170336, %v1656_v9  ;;  %v152_v47 = vld [vmem:[#allocation2 + $0xe0] sm:$0xff] }
  0x79   :  { %v590_v36 = vadd.f32 %v550_v63, %v430_v15  ;;  %v669_v14 = vadd.f32 %v629_v31, %v509_v38  ;;  %v899_v61 = vadd.f32 %v867_v0, %v1662_v53  ;;  %v1119_v32 = vadd.f32 %v1083_v26, %v1572_v17  ;;  %v232_v38 = vld [vmem:[#allocation2 + $0xe1] sm:$0xff] }
  0x7a   :  { %v1222_v25 = vadd.f32 %v1190_v20, %v1613_v58  ;;  %v630_v11 = vmul.f32 0.023647603, %v550_v63  ;;  %v988_v43 = vadd.f32 %v1640_v55, %v1547_v8  ;;  %v1020_v45 = vmul.f32 0.030364122, %v1542_v6  ;;  %v2202_v55 = vld [vmem:[#allocation6_spill] sm:$0xff] }
  0x7b   :  { %v1698_v37 = vadd.f32 %v710_v56, %v590_v36  ;;  %v1707_v10 = vmul.f32 0.023647603, %v1686_v33  ;;  %v1151_v52 = vadd.f32 %v1119_v32, %v1576_v19  ;;  %v510_v17 = vadd.f32 %v470_v29, %v350_v39  ;;  %v551_v31 = vld [vmem:[#allocation2 + $0xdb] sm:$0xff] }
  0x7c   :  { %1254 = vst [vmem:[%s2184_s1 + $0x28] sm:$0xff] %v1222_v25  ;;  %v191_v59 = vmul.f32 0.011170336, %v151_v34  ;;  %v900_v49 = vadd.f32 %v868_v42, %v1684_v46  ;;  %v1052_v54 = vadd.f32 %v1020_v45, %v988_v43  ;;  %v271_v22 = vadd.f32 %v231_v28, %v151_v34  ;;  %v392_v25 = vld [vmem:[#allocation2 + $0xe2] sm:$0xff]  ;;  %v153_v45 = vld [vmem:[#allocation2 + $0xf0] sm:$0xff] }
  0x7d   :  { %v311_v48 = vmul.f32 0.023647603, %v231_v28  ;;  %v1711_v13 = vadd.f32 %v789_v62, %v669_v14  ;;  %v963_v6 = vadd.f32 %v1707_v10, %v899_v61  ;;  %v1191_v8 = vadd.f32 %v1151_v52, %v867_v0 }
  0x7e   :  { %v471_v40 = vmul.f32 0.030364122, %v2202_v55  ;;  %v1716_v50 = vmul.f32 0.023647603, %v1698_v37  ;;  %v1084_v7 = vadd.f32 %v1052_v54, %v1549_v35  ;;  %v431_v2 = vadd.f32 %v271_v22, %v2202_v55  ;;  %v711_v35 = vld [vmem:[#allocation2 + $0xdc] sm:$0xff]  ;;  %v233_v22 = vld [vmem:[#allocation2 + $0xf1] sm:$0xff] }
  0x7f   :  { %v351_v51 = vadd.f32 %v311_v48, %v191_v59  ;;  %v1223_v18 = vadd.f32 %v1191_v8, %v1662_v53  ;;  %v670_v5 = vadd.f32 %v630_v11, %v510_v17  ;;  %v790_v4 = vmul.f32 0.011170336, %v710_v56  ;;  %v552_v54 = vld [vmem:[#allocation2 + $0xe3] sm:$0xff] }
  0x80   :  { %v1021_v24 = vmul.f32 0.030364122, %v1564_v21  ;;  %v964_v0 = vadd.f32 %v1716_v50, %v900_v49  ;;  %v1120_v15 = vadd.f32 %v1084_v7, %v1605_v57  ;;  %v591_v26 = vadd.f32 %v551_v31, %v431_v2 }
  0x81   :  { %v511_v20 = vadd.f32 %v471_v40, %v351_v51  ;;  %1255 = vst [vmem:[%s2184_s1 + $0x30] sm:$0xff] %v1223_v18  ;;  %v869_v39 = vmul.f32 0.011170336, %v1686_v33  ;;  %v192_v63 = vmul.f32 0.011170336, %v152_v47  ;;  %v272_v62 = vadd.f32 %v232_v38, %v152_v47  ;;  %v393_v18 = vld [vmem:[#allocation2 + $0xf2] sm:$0xff] }
  0x82   :  { %v1053_v29 = vadd.f32 %v1021_v24, %v1519_v60  ;;  %v1730_v36 = vadd.f32 %v963_v6, %v1711_v13  ;;  %v1152_v21 = vadd.f32 %v1120_v15, %v1613_v58  ;;  %v631_v34 = vmul.f32 0.023647603, %v551_v31 }
  0x83   :  { %v312_v57 = vmul.f32 0.023647603, %v232_v38  ;;  %v1733_v14 = vadd.f32 %v790_v4, %v670_v5  ;;  %v1735_v61 = vadd.f32 %v711_v35, %v591_v26  ;;  %v432_v56 = vadd.f32 %v392_v25, %v272_v62  ;;  %v154_v26 = vld [vmem:[#allocation2 + $0xf8] sm:$0xff] }
  0x84   :  { %v1085_v32 = vadd.f32 %v1053_v29, %v1576_v19  ;;  %v1192_v28 = vadd.f32 %v1152_v21, %v868_v42  ;;  %v671_v11 = vadd.f32 %v631_v34, %v511_v20  ;;  %v791_v60 = vmul.f32 0.011170336, %v711_v35  ;;  %v712_v19 = vld [vmem:[#allocation2 + $0xe4] sm:$0xff]  ;;  %v234_v35 = vld [vmem:[#allocation2 + $0xf9] sm:$0xff] }
  0x85   :  { %v352_v43 = vadd.f32 %v312_v57, %v192_v63  ;;  %v1739_v52 = vadd.f32 %v964_v0, %v1733_v14  ;;  %v901_v17 = vadd.f32 %v869_v39, %v1711_v13  ;;  %v472_v49 = vmul.f32 0.030364122, %v392_v25  ;;  %v553_v21 = vld [vmem:[#allocation2 + $0xf3] sm:$0xff] }
  0x86   :  { %v1121_v59 = vadd.f32 %v1085_v32, %v1651_v16  ;;  %v1224_v48 = vadd.f32 %v1192_v28, %v1684_v46  ;;  %v592_v6 = vadd.f32 %v552_v54, %v432_v56  ;;  %v870_v42 = vmul.f32 0.011170336, %v1698_v37  ;;  %v713_v56 = vld [vmem:[#allocation2 + $0xf4] sm:$0xff] }
  0x87   :  { %v1022_v8 = vmul.f32 0.030364122, %v1597_v3  ;;  %v1747_v55 = vmul.f32 0.023647603, %v1735_v61  ;;  %v512_v7 = vadd.f32 %v472_v49, %v352_v43  ;;  %v193_v51 = vmul.f32 0.011170336, %v153_v45 }
  0x88   :  { %v1153_v40 = vadd.f32 %v1121_v59, %v1662_v53  ;;  %1256 = vst [vmem:[%s2184_s1 + $0x38] sm:$0xff] %v1224_v48  ;;  %v1753_v16 = vadd.f32 %v791_v60, %v671_v11  ;;  %v632_v2 = vmul.f32 0.023647603, %v552_v54  ;;  %v273_v38 = vadd.f32 %v233_v22, %v153_v45 }
  0x89   :  { %v1054_v47 = vadd.f32 %v1022_v8, %v1633_v44  ;;  %v965_v3 = vadd.f32 %v1747_v55, %v901_v17  ;;  %v792_v4 = vmul.f32 0.011170336, %v712_v19  ;;  %v313_v31 = vmul.f32 0.023647603, %v233_v22  ;;  %v394_v17 = vld [vmem:[#allocation2 + $0xfa] sm:$0xff] }
  0x8a   :  { %v1193_v5 = vadd.f32 %v1153_v40, %v869_v39  ;;  %v1757_v24 = vadd.f32 %v712_v19, %v592_v6  ;;  %v902_v0 = vadd.f32 %v870_v42, %v1733_v14  ;;  %v433_v20 = vadd.f32 %v393_v18, %v273_v38  ;;  %v554_v8 = vld [vmem:[#allocation2 + $0xfb] sm:$0xff]  ;;  %v155_v40 = vld [vmem:[#allocation2 + $0x108] sm:$0xff] }
  0x8b   :  { %v1086_v15 = vadd.f32 %v1054_v47, %v1613_v58  ;;  %v672_v63 = vadd.f32 %v632_v2, %v512_v7  ;;  %v353_v44 = vadd.f32 %v313_v31, %v193_v51  ;;  %v473_v62 = vmul.f32 0.030364122, %v393_v18  ;;  %v235_v47 = vld [vmem:[#allocation2 + $0x109] sm:$0xff] }
  0x8c   :  { %v1225_v29 = vadd.f32 %v1193_v5, %v1711_v13  ;;  %v593_v39 = vadd.f32 %v553_v21, %v433_v20  ;;  %v871_v57 = vmul.f32 0.011170336, %v1735_v61  ;;  %v1023_v25 = vmul.f32 0.030364122, %v1635_v41 }
  0x8d   :  { %v1122_v34 = vadd.f32 %v1086_v15, %v1670_v23  ;;  %v1766_v32 = vadd.f32 %v965_v3, %v1753_v16  ;;  %v513_v58 = vadd.f32 %v473_v62, %v353_v44  ;;  %v194_v28 = vmul.f32 0.011170336, %v154_v26  ;;  %v395_v62 = vld [vmem:[#allocation2 + $0x10a] sm:$0xff] }
  0x8e   :  { %1257 = vst [vmem:[%s2184_s1 + $0x40] sm:$0xff] %v1225_v29  ;;  %v274_v11 = vadd.f32 %v234_v35, %v154_v26  ;;  %v633_v43 = vmul.f32 0.023647603, %v553_v21  ;;  %v1772_v23 = vadd.f32 %v713_v56, %v593_v39  ;;  %v1055_v45 = vadd.f32 %v1023_v25, %v1586_v12  ;;  %v555_v25 = vld [vmem:[#allocation2 + $0x10b] sm:$0xff] }
  0x8f   :  { %v1154_v60 = vadd.f32 %v1122_v34, %v1684_v46  ;;  %v1776_v41 = vmul.f32 0.023647603, %v1757_v24  ;;  %v903_v59 = vadd.f32 %v871_v57, %v1753_v16  ;;  %v314_v49 = vmul.f32 0.023647603, %v234_v35 }
  0x90   :  { %v434_v54 = vadd.f32 %v394_v17, %v274_v11  ;;  %v1779_v22 = vadd.f32 %v792_v4, %v672_v63  ;;  %v673_v6 = vadd.f32 %v633_v43, %v513_v58  ;;  %v1087_v19 = vadd.f32 %v1055_v45, %v1662_v53  ;;  %v714_v53 = vld [vmem:[#allocation2 + $0xfc] sm:$0xff]  ;;  %v236_v43 = vld [vmem:[#allocation2 + $0x111] sm:$0xff] }
  0x91   :  { %v1194_v48 = vadd.f32 %v1154_v60, %v870_v42  ;;  %v1783_v7 = vmul.f32 0.023647603, %v1772_v23  ;;  %v354_v12 = vadd.f32 %v314_v49, %v194_v28  ;;  %v474_v51 = vmul.f32 0.030364122, %v394_v17  ;;  %v156_v60 = vld [vmem:[#allocation2 + $0x110] sm:$0xff] }
  0x92   :  { %v594_v2 = vadd.f32 %v554_v8, %v434_v54  ;;  %v966_v38 = vadd.f32 %v1776_v41, %v902_v0  ;;  %v793_v3 = vmul.f32 0.011170336, %v713_v56  ;;  %v1123_v5 = vadd.f32 %v1087_v19, %v1707_v10  ;;  %v715_v49 = vld [vmem:[#allocation2 + $0x10c] sm:$0xff] }
  0x93   :  { %v1226_v18 = vadd.f32 %v1194_v48, %v1733_v14  ;;  %v967_v42 = vadd.f32 %v1783_v7, %v903_v59  ;;  %v514_v4 = vadd.f32 %v474_v51, %v354_v12  ;;  %v1024_v31 = vmul.f32 0.030364122, %v1656_v9  ;;  %v396_v12 = vld [vmem:[#allocation2 + $0x112] sm:$0xff] }
  0x94   :  { %v195_v15 = vmul.f32 0.011170336, %v155_v40  ;;  %v1155_v20 = vadd.f32 %v1123_v5, %v1711_v13  ;;  %v634_v26 = vmul.f32 0.023647603, %v554_v8  ;;  %v872_v0 = vmul.f32 0.011170336, %v1757_v24 }
  0x95   :  { %1258 = vst [vmem:[%s2184_s1 + $0x48] sm:$0xff] %v1226_v18  ;;  %v275_v35 = vadd.f32 %v235_v47, %v155_v40  ;;  %v1795_v29 = vadd.f32 %v793_v3, %v673_v6  ;;  %v1797_v10 = vadd.f32 %v714_v53, %v594_v2  ;;  %v1056_v63 = vadd.f32 %v1024_v31, %v1621_v1  ;;  %v556_v31 = vld [vmem:[#allocation2 + $0x113] sm:$0xff] }
  0x96   :  { %v315_v44 = vmul.f32 0.023647603, %v235_v47  ;;  %v1801_v9 = vadd.f32 %v966_v38, %v1779_v22  ;;  %v1195_v21 = vadd.f32 %v1155_v20, %v871_v57  ;;  %v794_v34 = vmul.f32 0.011170336, %v714_v53 }
  0x97   :  { %v435_v39 = vadd.f32 %v395_v62, %v275_v35  ;;  %v1804_v58 = vadd.f32 %v967_v42, %v1795_v29  ;;  %v674_v56 = vadd.f32 %v634_v26, %v514_v4  ;;  %v1088_v28 = vadd.f32 %v1056_v63, %v1684_v46  ;;  %v237_v63 = vld [vmem:[#allocation2 + $0x121] sm:$0xff] }
  0x98   :  { %v355_v11 = vadd.f32 %v315_v44, %v195_v15  ;;  %v1227_v1 = vadd.f32 %v1195_v21, %v1753_v16  ;;  %v904_v45 = vadd.f32 %v872_v0, %v1779_v22  ;;  %v475_v17 = vmul.f32 0.030364122, %v395_v62  ;;  %v157_v15 = vld [vmem:[#allocation2 + $0x120] sm:$0xff] }
  0x99   :  { %v595_v59 = vadd.f32 %v555_v25, %v435_v39  ;;  %v1810_v57 = vmul.f32 0.023647603, %v1797_v10  ;;  %v1124_v54 = vadd.f32 %v1088_v28, %v1716_v50  ;;  %v635_v48 = vmul.f32 0.023647603, %v555_v25 }
  0x9a   :  { %v1025_v6 = vmul.f32 0.030364122, %v1686_v33  ;;  %1259 = vst [vmem:[%s2184_s1 + $0x50] sm:$0xff] %v1227_v1  ;;  %v515_v46 = vadd.f32 %v475_v17, %v355_v11  ;;  %v873_v19 = vmul.f32 0.011170336, %v1772_v23  ;;  %v276_v40 = vadd.f32 %v236_v43, %v156_v60  ;;  %v238_v1 = vld [vmem:[#allocation2 + $0x129] sm:$0xff] }
  0x9b   :  { %v196_v8 = vmul.f32 0.011170336, %v156_v60  ;;  %v1818_v51 = vadd.f32 %v794_v34, %v674_v56  ;;  %v1156_v2 = vadd.f32 %v1124_v54, %v1733_v14  ;;  %v316_v50 = vmul.f32 0.023647603, %v236_v43  ;;  %v716_v34 = vld [vmem:[#allocation2 + $0x114] sm:$0xff]  ;;  %v158_v43 = vld [vmem:[#allocation2 + $0x128] sm:$0xff] }
  0x9c   :  { %v1057_v47 = vadd.f32 %v1025_v6, %v1674_v27  ;;  %v968_v38 = vadd.f32 %v1810_v57, %v904_v45  ;;  %v1823_v33 = vadd.f32 %v715_v49, %v595_v59  ;;  %v795_v18 = vmul.f32 0.011170336, %v715_v49 }
  0x9d   :  { %v436_v3 = vadd.f32 %v396_v12, %v276_v40  ;;  %v1196_v5 = vadd.f32 %v1156_v2, %v872_v0  ;;  %v356_v4 = vadd.f32 %v316_v50, %v196_v8  ;;  %v476_v53 = vmul.f32 0.030364122, %v396_v12  ;;  %v557_v12 = vld [vmem:[#allocation2 + $0x123] sm:$0xff] }
  0x9e   :  { %v1089_v42 = vadd.f32 %v1057_v47, %v1711_v13  ;;  %v675_v20 = vadd.f32 %v635_v48, %v515_v46  ;;  %v905_v26 = vadd.f32 %v873_v19, %v1795_v29  ;;  %v874_v27 = vmul.f32 0.011170336, %v1797_v10 }
  0x9f   :  { %v596_v35 = vadd.f32 %v556_v31, %v436_v3  ;;  %v1228_v44 = vadd.f32 %v1196_v5, %v1779_v22  ;;  %v516_v21 = vadd.f32 %v476_v53, %v356_v4  ;;  %v1026_v0 = vmul.f32 0.030364122, %v1698_v37  ;;  %v397_v37 = vld [vmem:[#allocation2 + $0x122] sm:$0xff]  ;;  %v398_v4 = vld [vmem:[#allocation2 + $0x12a] sm:$0xff] }
  0xa0   :  { %v1125_v62 = vadd.f32 %v1089_v42, %v1747_v55  ;;  %v1832_v13 = vadd.f32 %v968_v38, %v1818_v51  ;;  %v1835_v39 = vmul.f32 0.023647603, %v1823_v33  ;;  %v197_v56 = vmul.f32 0.011170336, %v157_v15  ;;  %v717_v5 = vld [vmem:[#allocation2 + $0x124] sm:$0xff] }
  0xa1   :  { %v1837_v25 = vadd.f32 %v716_v34, %v596_v35  ;;  %1260 = vst [vmem:[%s2184_s1 + $0x58] sm:$0xff] %v1228_v44  ;;  %v636_v55 = vmul.f32 0.023647603, %v556_v31  ;;  %v1058_v11 = vadd.f32 %v1026_v0, %v1692_v30  ;;  %v277_v60 = vadd.f32 %v237_v63, %v157_v15  ;;  %v159_v0 = vld [vmem:[#allocation2 + $0x138] sm:$0xff] }
  0xa2   :  { %v1157_v28 = vadd.f32 %v1125_v62, %v1753_v16  ;;  %v1844_v45 = vadd.f32 %v795_v18, %v675_v20  ;;  %v969_v17 = vadd.f32 %v1835_v39, %v905_v26  ;;  %v906_v59 = vadd.f32 %v874_v27, %v1818_v51 }
  0xa3   :  { %v317_v49 = vmul.f32 0.023647603, %v237_v63  ;;  %v676_v48 = vadd.f32 %v636_v55, %v516_v21  ;;  %v1090_v6 = vadd.f32 %v1058_v11, %v1733_v14  ;;  %v437_v46 = vadd.f32 %v397_v37, %v277_v60  ;;  %v239_v60 = vld [vmem:[#allocation2 + $0x139] sm:$0xff] }
  0xa4   :  { %v1197_v54 = vadd.f32 %v1157_v28, %v873_v19  ;;  %v1850_v8 = vmul.f32 0.023647603, %v1837_v25  ;;  %v477_v40 = vmul.f32 0.030364122, %v397_v37  ;;  %v278_v2 = vadd.f32 %v238_v1, %v158_v43 }
  0xa5   :  { %v357_v30 = vadd.f32 %v317_v49, %v197_v56  ;;  %v796_v50 = vmul.f32 0.011170336, %v716_v34  ;;  %v1126_v38 = vadd.f32 %v1090_v6, %v1776_v41  ;;  %v597_v18 = vadd.f32 %v557_v12, %v437_v46  ;;  %v558_v34 = vld [vmem:[#allocation2 + $0x12b] sm:$0xff] }
  0xa6   :  { %v1229_v47 = vadd.f32 %v1197_v54, %v1795_v29  ;;  %v970_v3 = vadd.f32 %v1850_v8, %v906_v59  ;;  %v1027_v14 = vmul.f32 0.030364122, %v1735_v61  ;;  %v198_v42 = vmul.f32 0.011170336, %v158_v43 }
  0xa7   :  { %v517_v19 = vadd.f32 %v477_v40, %v357_v30  ;;  %v1158_v53 = vadd.f32 %v1126_v38, %v1779_v22  ;;  %v637_v31 = vmul.f32 0.023647603, %v557_v12  ;;  %v875_v15 = vmul.f32 0.011170336, %v1823_v33  ;;  %v399_v30 = vld [vmem:[#allocation2 + $0x13a] sm:$0xff] }
  0xa8   :  { %1261 = vst [vmem:[%s2184_s1 + $0x60] sm:$0xff] %v1229_v47  ;;  %v318_v20 = vmul.f32 0.023647603, %v238_v1  ;;  %v1861_v41 = vadd.f32 %v796_v50, %v676_v48  ;;  %v1863_v26 = vadd.f32 %v717_v5, %v597_v18  ;;  %v1059_v35 = vadd.f32 %v1027_v14, %v1730_v36  ;;  %v718_v1 = vld [vmem:[#allocation2 + $0x12c] sm:$0xff]  ;;  %v559_v14 = vld [vmem:[#allocation2 + $0x13b] sm:$0xff] }
  0xa9   :  { %v438_v63 = vadd.f32 %v398_v4, %v278_v2  ;;  %v1198_v61 = vadd.f32 %v1158_v53, %v874_v27  ;;  %v677_v44 = vadd.f32 %v637_v31, %v517_v19  ;;  %v478_v21 = vmul.f32 0.030364122, %v398_v4 }
  0xaa   :  { %v358_v62 = vadd.f32 %v318_v20, %v198_v42  ;;  %v1867_v56 = vadd.f32 %v969_v17, %v1844_v45  ;;  %v797_v28 = vmul.f32 0.011170336, %v717_v5  ;;  %v1091_v55 = vadd.f32 %v1059_v35, %v1753_v16  ;;  %v160_v42 = vld [vmem:[#allocation2 + $0x140] sm:$0xff] }
  0xab   :  { %v598_v11 = vadd.f32 %v558_v34, %v438_v63  ;;  %v1871_v37 = vadd.f32 %v970_v3, %v1861_v41  ;;  %v1230_v36 = vadd.f32 %v1198_v61, %v1818_v51  ;;  %v907_v27 = vadd.f32 %v875_v15, %v1844_v45  ;;  %v240_v20 = vld [vmem:[#allocation2 + $0x141] sm:$0xff] }
  0xac   :  { %v518_v43 = vadd.f32 %v478_v21, %v358_v62  ;;  %v1876_v59 = vmul.f32 0.023647603, %v1863_v26  ;;  %v1127_v17 = vadd.f32 %v1091_v55, %v1783_v7  ;;  %v1028_v49 = vmul.f32 0.030364122, %v1757_v24  ;;  %v719_v61 = vld [vmem:[#allocation2 + $0x13c] sm:$0xff] }
  0xad   :  { %v199_v54 = vmul.f32 0.011170336, %v159_v0  ;;  %1262 = vst [vmem:[%s2184_s1 + $0x68] sm:$0xff] %v1230_v36  ;;  %v1883_v16 = vadd.f32 %v797_v28, %v677_v44  ;;  %v638_v48 = vmul.f32 0.023647603, %v558_v34  ;;  %v279_v46 = vadd.f32 %v239_v60, %v159_v0  ;;  %v400_v0 = vld [vmem:[#allocation2 + $0x142] sm:$0xff] }
  0xae   :  { %v876_v6 = vmul.f32 0.011170336, %v1837_v25  ;;  %v1159_v40 = vadd.f32 %v1127_v17, %v1795_v29  ;;  %v1887_v12 = vadd.f32 %v718_v1, %v598_v11  ;;  %v1060_v7 = vadd.f32 %v1028_v49, %v1739_v52  ;;  %v560_v49 = vld [vmem:[#allocation2 + $0x143] sm:$0xff] }
  0xaf   :  { %v319_v2 = vmul.f32 0.023647603, %v239_v60  ;;  %v971_v24 = vadd.f32 %v1876_v59, %v907_v27  ;;  %v678_v47 = vadd.f32 %v638_v48, %v518_v43  ;;  %v798_v50 = vmul.f32 0.011170336, %v718_v1 }
  0xb0   :  { %v439_v38 = vadd.f32 %v399_v30, %v279_v46  ;;  %v1199_v18 = vadd.f32 %v1159_v40, %v875_v15  ;;  %v1092_v3 = vadd.f32 %v1060_v7, %v1779_v22  ;;  %v479_v5 = vmul.f32 0.030364122, %v399_v30  ;;  %v241_v7 = vld [vmem:[#allocation2 + $0x151] sm:$0xff] }
  0xb1   :  { %v359_v19 = vadd.f32 %v319_v2, %v199_v54  ;;  %v908_v4 = vadd.f32 %v876_v6, %v1861_v41  ;;  %v877_v31 = vmul.f32 0.011170336, %v1863_v26  ;;  %v1029_v52 = vmul.f32 0.030364122, %v1772_v23  ;;  %v161_v54 = vld [vmem:[#allocation2 + $0x150] sm:$0xff] }
  0xb2   :  { %v599_v53 = vadd.f32 %v559_v14, %v439_v38  ;;  %v1231_v35 = vadd.f32 %v1199_v18, %v1844_v45  ;;  %v1897_v63 = vmul.f32 0.023647603, %v1887_v12  ;;  %v1128_v15 = vadd.f32 %v1092_v3, %v1810_v57 }
  0xb3   :  { %v519_v22 = vadd.f32 %v479_v5, %v359_v19  ;;  %v639_v44 = vmul.f32 0.023647603, %v559_v14  ;;  %v1061_v21 = vadd.f32 %v1029_v52, %v1766_v32  ;;  %v200_v34 = vmul.f32 0.011170336, %v160_v42 }
  0xb4   :  { %v1900_v62 = vadd.f32 %v719_v61, %v599_v53  ;;  %1263 = vst [vmem:[%s2184_s1 + $0x70] sm:$0xff] %v1231_v35  ;;  %v1160_v23 = vadd.f32 %v1128_v15, %v1818_v51  ;;  %v909_v28 = vadd.f32 %v877_v31, %v1883_v16  ;;  %v280_v55 = vadd.f32 %v240_v20, %v160_v42  ;;  %v401_v42 = vld [vmem:[#allocation2 + $0x152] sm:$0xff] }
  0xb5   :  { %v320_v11 = vmul.f32 0.023647603, %v240_v20  ;;  %v972_v57 = vadd.f32 %v1897_v63, %v908_v4  ;;  %v679_v60 = vadd.f32 %v639_v44, %v519_v22  ;;  %v1093_v32 = vadd.f32 %v1061_v21, %v1795_v29  ;;  %v242_v44 = vld [vmem:[#allocation2 + $0x159] sm:$0xff] }
  0xb6   :  { %v1910_v36 = vmul.f32 0.023647603, %v1900_v62  ;;  %v1200_v27 = vadd.f32 %v1160_v23, %v876_v6  ;;  %v440_v1 = vadd.f32 %v400_v0, %v280_v55  ;;  %v480_v17 = vmul.f32 0.030364122, %v400_v0  ;;  %v720_v6 = vld [vmem:[#allocation2 + $0x144] sm:$0xff]  ;;  %v561_v0 = vld [vmem:[#allocation2 + $0x153] sm:$0xff] }
  0xb7   :  { %v360_v43 = vadd.f32 %v320_v11, %v200_v34  ;;  %v1914_v48 = vadd.f32 %v971_v24, %v1883_v16  ;;  %v1916_v46 = vadd.f32 %v798_v50, %v678_v47  ;;  %v799_v30 = vmul.f32 0.011170336, %v719_v61  ;;  %v162_v61 = vld [vmem:[#allocation2 + $0x158] sm:$0xff] }
  0xb8   :  { %v1129_v40 = vadd.f32 %v1093_v32, %v1835_v39  ;;  %v1232_v2 = vadd.f32 %v1200_v27, %v1861_v41  ;;  %v973_v38 = vadd.f32 %v1910_v36, %v909_v28  ;;  %v1030_v18 = vmul.f32 0.030364122, %v1797_v10 }
  0xb9   :  { %v520_v29 = vadd.f32 %v480_v17, %v360_v43  ;;  %v1923_v3 = vadd.f32 %v972_v57, %v1916_v46  ;;  %v640_v19 = vmul.f32 0.023647603, %v560_v49  ;;  %v201_v47 = vmul.f32 0.011170336, %v161_v54 }
  0xba   :  { %v1161_v24 = vadd.f32 %v1129_v40, %v1844_v45  ;;  %1264 = vst [vmem:[%s2184_s1 + $0x78] sm:$0xff] %v1232_v2  ;;  %v1929_v39 = vadd.f32 %v799_v30, %v679_v60  ;;  %v600_v50 = vadd.f32 %v560_v49, %v440_v1  ;;  %v1062_v5 = vadd.f32 %v1030_v18, %v1801_v9  ;;  %v721_v60 = vld [vmem:[#allocation2 + $0x154] sm:$0xff]  ;;  %v163_v18 = vld [vmem:[#allocation2 + $0x168] sm:$0xff] }
  0xbb   :  { %v281_v14 = vadd.f32 %v241_v7, %v161_v54  ;;  %v800_v10 = vmul.f32 0.011170336, %v720_v6  ;;  %v878_v53 = vmul.f32 0.011170336, %v1887_v12  ;;  %v321_v52 = vmul.f32 0.023647603, %v241_v7 }
  0xbc   :  { %v1201_v4 = vadd.f32 %v1161_v24, %v877_v31  ;;  %v1934_v20 = vadd.f32 %v973_v38, %v1929_v39  ;;  %v680_v35 = vadd.f32 %v640_v19, %v520_v29  ;;  %v1094_v15 = vadd.f32 %v1062_v5, %v1818_v51  ;;  %v402_v49 = vld [vmem:[#allocation2 + $0x15a] sm:$0xff] }
  0xbd   :  { %v441_v22 = vadd.f32 %v401_v42, %v281_v14  ;;  %v361_v34 = vadd.f32 %v321_v52, %v201_v47  ;;  %v481_v9 = vmul.f32 0.030364122, %v401_v42  ;;  %v879_v31 = vmul.f32 0.011170336, %v1900_v62 }
  0xbe   :  { %v1233_v21 = vadd.f32 %v1201_v4, %v1883_v16  ;;  %v1939_v23 = vadd.f32 %v720_v6, %v600_v50  ;;  %v1130_v28 = vadd.f32 %v1094_v15, %v1850_v8  ;;  %v1031_v11 = vmul.f32 0.030364122, %v1823_v33  ;;  %v562_v6 = vld [vmem:[#allocation2 + $0x15b] sm:$0xff]  ;;  %v243_v50 = vld [vmem:[#allocation2 + $0x169] sm:$0xff] }
  0xbf   :  { %v601_v55 = vadd.f32 %v561_v0, %v441_v22  ;;  %v910_v51 = vadd.f32 %v878_v53, %v1916_v46  ;;  %v521_v57 = vadd.f32 %v481_v9, %v361_v34  ;;  %v202_v32 = vmul.f32 0.011170336, %v162_v61 }
  0xc0   :  { %1265 = vst [vmem:[%s2184_s1 + $0x80] sm:$0xff] %v1233_v21  ;;  %v282_v27 = vadd.f32 %v242_v44, %v162_v61  ;;  %v1162_v43 = vadd.f32 %v1130_v28, %v1861_v41  ;;  %v641_v1 = vmul.f32 0.023647603, %v561_v0  ;;  %v1063_v8 = vadd.f32 %v1031_v11, %v1804_v58  ;;  %v403_v0 = vld [vmem:[#allocation2 + $0x16a] sm:$0xff] }
  0xc1   :  { %v1948_v17 = vadd.f32 %v721_v60, %v601_v55  ;;  %v1951_v54 = vadd.f32 %v800_v10, %v680_v35  ;;  %v911_v33 = vadd.f32 %v879_v31, %v1929_v39  ;;  %v322_v30 = vmul.f32 0.023647603, %v242_v44 }
  0xc2   :  { %v442_v40 = vadd.f32 %v402_v49, %v282_v27  ;;  %v1955_v7 = vmul.f32 0.023647603, %v1939_v23  ;;  %v1202_v2 = vadd.f32 %v1162_v43, %v878_v53  ;;  %v681_v38 = vadd.f32 %v641_v1, %v521_v57  ;;  %v164_v43 = vld [vmem:[#allocation2 + $0x170] sm:$0xff] }
  0xc3   :  { %v1095_v29 = vadd.f32 %v1063_v8, %v1844_v45  ;;  %v1959_v24 = vmul.f32 0.023647603, %v1948_v17  ;;  %v362_v58 = vadd.f32 %v322_v30, %v202_v32  ;;  %v482_v19 = vmul.f32 0.030364122, %v402_v49  ;;  %v722_v45 = vld [vmem:[#allocation2 + $0x15c] sm:$0xff]  ;;  %v244_v1 = vld [vmem:[#allocation2 + $0x171] sm:$0xff] }
  0xc4   :  { %v602_v47 = vadd.f32 %v562_v6, %v442_v40  ;;  %v974_v5 = vadd.f32 %v1955_v7, %v910_v51  ;;  %v1234_v14 = vadd.f32 %v1202_v2, %v1916_v46  ;;  %v801_v42 = vmul.f32 0.011170336, %v721_v60  ;;  %v563_v51 = vld [vmem:[#allocation2 + $0x16b] sm:$0xff] }
  0xc5   :  { %v1131_v4 = vadd.f32 %v1095_v29, %v1876_v59  ;;  %v975_v10 = vadd.f32 %v1959_v24, %v911_v33  ;;  %v522_v53 = vadd.f32 %v482_v19, %v362_v58  ;;  %v1032_v52 = vmul.f32 0.030364122, %v1837_v25  ;;  %v723_v30 = vld [vmem:[#allocation2 + $0x16c] sm:$0xff] }
  0xc6   :  { %v203_v35 = vmul.f32 0.011170336, %v163_v18  ;;  %1266 = vst [vmem:[%s2184_s1 + $0x88] sm:$0xff] %v1234_v14  ;;  %v642_v22 = vmul.f32 0.023647603, %v562_v6  ;;  %v283_v44 = vadd.f32 %v243_v50, %v163_v18  ;;  %v1971_v21 = vadd.f32 %v801_v42, %v681_v38  ;;  %v404_v58 = vld [vmem:[#allocation2 + $0x172] sm:$0xff] }
  0xc7   :  { %v1163_v15 = vadd.f32 %v1131_v4, %v1883_v16  ;;  %v880_v61 = vmul.f32 0.011170336, %v1939_v23  ;;  %v1973_v59 = vadd.f32 %v722_v45, %v602_v47  ;;  %v1064_v34 = vadd.f32 %v1032_v52, %v1832_v13  ;;  %v564_v52 = vld [vmem:[#allocation2 + $0x173] sm:$0xff] }
  0xc8   :  { %v323_v9 = vmul.f32 0.023647603, %v243_v50  ;;  %v1977_v25 = vadd.f32 %v974_v5, %v1951_v54  ;;  %v802_v55 = vmul.f32 0.011170336, %v722_v45  ;;  %v443_v11 = vadd.f32 %v403_v0, %v283_v44 }
  0xc9   :  { %v1203_v28 = vadd.f32 %v1163_v15, %v879_v31  ;;  %v1980_v57 = vadd.f32 %v975_v10, %v1971_v21  ;;  %v682_v60 = vadd.f32 %v642_v22, %v522_v53  ;;  %v1096_v32 = vadd.f32 %v1064_v34, %v1861_v41  ;;  %v245_v15 = vld [vmem:[#allocation2 + $0x181] sm:$0xff] }
  0xca   :  { %v363_v27 = vadd.f32 %v323_v9, %v203_v35  ;;  %v912_v8 = vadd.f32 %v880_v61, %v1951_v54  ;;  %v483_v49 = vmul.f32 0.030364122, %v403_v0  ;;  %v603_v33 = vadd.f32 %v563_v51, %v443_v11  ;;  %v165_v35 = vld [vmem:[#allocation2 + $0x180] sm:$0xff]  ;;  %v2007_v11 = vld [vmem:[#allocation2 + $0x188] sm:$0xff] }
  0xcb   :  { %v1235_v13 = vadd.f32 %v1203_v28, %v1929_v39  ;;  %v1986_v31 = vmul.f32 0.023647603, %v1973_v59  ;;  %v1132_v40 = vadd.f32 %v1096_v32, %v1897_v63  ;;  %v643_v2 = vmul.f32 0.023647603, %v563_v51  ;;  %v246_v51 = vld [vmem:[#allocation2 + $0x189] sm:$0xff] }
  0xcc   :  { %v1033_v38 = vmul.f32 0.030364122, %v1863_v26  ;;  %v523_v41 = vadd.f32 %v483_v49, %v363_v27  ;;  %v881_v29 = vmul.f32 0.011170336, %v1948_v17  ;;  %v204_v6 = vmul.f32 0.011170336, %v164_v43 }
  0xcd   :  { %1267 = vst [vmem:[%s2184_s1 + $0x90] sm:$0xff] %v1235_v13  ;;  %v284_v18 = vadd.f32 %v244_v1, %v164_v43  ;;  %v1994_v19 = vadd.f32 %v802_v55, %v682_v60  ;;  %v1164_v47 = vadd.f32 %v1132_v40, %v1916_v46  ;;  %v324_v63 = vmul.f32 0.023647603, %v244_v1 }
  0xce   :  { %v1065_v50 = vadd.f32 %v1033_v38, %v1867_v56  ;;  %v976_v5 = vadd.f32 %v1986_v31, %v912_v8  ;;  %v1999_v26 = vadd.f32 %v723_v30, %v603_v33  ;;  %v803_v14 = vmul.f32 0.011170336, %v723_v30  ;;  %v724_v56 = vld [vmem:[#allocation2 + $0x174] sm:$0xff] }
  0xcf   :  { %v444_v42 = vadd.f32 %v404_v58, %v284_v18  ;;  %v1204_v4 = vadd.f32 %v1164_v47, %v880_v61  ;;  %v364_v53 = vadd.f32 %v324_v63, %v204_v6  ;;  %v484_v45 = vmul.f32 0.030364122, %v404_v58  ;;  %v565_v6 = vld [vmem:[#allocation2 + $0x183] sm:$0xff] }
  0xd0   :  { %v1097_v10 = vadd.f32 %v1065_v50, %v1883_v16  ;;  %v683_v22 = vadd.f32 %v643_v2, %v523_v41  ;;  %v913_v44 = vadd.f32 %v881_v29, %v1971_v21  ;;  %v882_v9 = vmul.f32 0.011170336, %v1973_v59  ;;  %v405_v16 = vld [vmem:[#allocation2 + $0x182] sm:$0xff]  ;;  %v406_v18 = vld [vmem:[#allocation2 + $0x18a] sm:$0xff] }
  0xd1   :  { %v604_v34 = vadd.f32 %v564_v52, %v444_v42  ;;  %v1236_v0 = vadd.f32 %v1204_v4, %v1951_v54  ;;  %v524_v55 = vadd.f32 %v484_v45, %v364_v53  ;;  %v1034_v61 = vmul.f32 0.030364122, %v1887_v12 }
  0xd2   :  { %v1133_v28 = vadd.f32 %v1097_v10, %v1910_v36  ;;  %v2010_v60 = vadd.f32 %v976_v5, %v1994_v19  ;;  %v644_v32 = vmul.f32 0.023647603, %v564_v52  ;;  %v285_v43 = vadd.f32 %v245_v15, %v165_v35  ;;  %v725_v10 = vld [vmem:[#allocation2 + $0x184] sm:$0xff] }
  0xd3   :  { %v2012_v27 = vadd.f32 %v724_v56, %v604_v34  ;;  %1268 = vst [vmem:[%s2184_s1 + $0x98] sm:$0xff] %v1236_v0  ;;  %v2018_v36 = vmul.f32 0.023647603, %v1999_v26  ;;  %v914_v1 = vadd.f32 %v882_v9, %v1994_v19  ;;  %v1066_v13 = vadd.f32 %v1034_v61, %v1871_v37 }
  0xd4   :  { %v1165_v12 = vadd.f32 %v1133_v28, %v1929_v39  ;;  %v684_v8 = vadd.f32 %v644_v32, %v524_v55  ;;  %v445_v49 = vadd.f32 %v405_v16, %v285_v43  ;;  %v1035_v33 = vmul.f32 0.030364122, %v1900_v62 }
  0xd5   :  { %v286_v30 = vadd.f32 %v246_v51, %v2007_v11  ;;  %v2025_v40 = vadd.f32 %v803_v14, %v683_v22  ;;  %v977_v2 = vadd.f32 %v2018_v36, %v913_v44  ;;  %v1098_v41 = vadd.f32 %v1066_v13, %v1916_v46 }
  0xd6   :  { %v1205_v38 = vadd.f32 %v1165_v12, %v881_v29  ;;  %v804_v58 = vmul.f32 0.011170336, %v724_v56  ;;  %v2030_v47 = vmul.f32 0.023647603, %v2012_v27  ;;  %v605_v37 = vadd.f32 %v565_v6, %v445_v49  ;;  %v566_v56 = vld [vmem:[#allocation2 + $0x18b] sm:$0xff] }
  0xd7   :  { %v1067_v50 = vadd.f32 %v1035_v33, %v1914_v48  ;;  %v1134_v63 = vadd.f32 %v1098_v41, %v1955_v7  ;;  %v883_v5 = vmul.f32 0.011170336, %v1999_v26  ;;  %v1036_v14 = vmul.f32 0.030364122, %v1939_v23  ;;  %v247_v33 = vld [vmem:[#allocation2 + $0x199] sm:$0xff]  ;;  %v726_v41 = vld [vmem:[#allocation2 + $0x18c] sm:$0xff] }
  0xd8   :  { %v1237_v62 = vadd.f32 %v1205_v38, %v1971_v21  ;;  %v2037_v29 = vadd.f32 %v804_v58, %v684_v8  ;;  %v978_v46 = vadd.f32 %v2030_v47, %v914_v1  ;;  %v446_v4 = vadd.f32 %v406_v18, %v286_v30 }
  0xd9   :  { %v1099_v42 = vadd.f32 %v1067_v50, %v1929_v39  ;;  %v1166_v48 = vadd.f32 %v1134_v63, %v1951_v54  ;;  %v884_v7 = vmul.f32 0.011170336, %v2012_v27  ;;  %v1068_v53 = vadd.f32 %v1036_v14, %v1923_v3  ;;  %v567_v63 = vld [vmem:[#allocation2 + $0x19b] sm:$0xff] }
  0xda   :  { %1269 = vst [vmem:[%s2184_s1 + $0xa0] sm:$0xff] %v1237_v62  ;;  %v205_v45 = vmul.f32 0.011170336, %v165_v35  ;;  %v2048_v23 = vadd.f32 %v977_v2, %v2025_v40  ;;  %v2050_v52 = vadd.f32 %v725_v10, %v605_v37  ;;  %v325_v22 = vmul.f32 0.023647603, %v245_v15  ;;  %v407_v62 = vld [vmem:[#allocation2 + $0x19a] sm:$0xff] }
  0xdb   :  { %v1135_v39 = vadd.f32 %v1099_v42, %v1959_v24  ;;  %v1206_v44 = vadd.f32 %v1166_v48, %v882_v9  ;;  %v2054_v34 = vadd.f32 %v883_v5, %v2025_v40  ;;  %v1100_v0 = vadd.f32 %v1068_v53, %v1951_v54 }
  0xdc   :  { %v485_v28 = vmul.f32 0.030364122, %v405_v16  ;;  %v2058_v55 = vadd.f32 %v978_v46, %v2037_v29  ;;  %v606_v35 = vadd.f32 %v566_v56, %v446_v4  ;;  %v365_v61 = vadd.f32 %v325_v22, %v205_v45  ;;  %v248_v4 = vld [vmem:[#allocation2 + $0x1a1] sm:$0xff] }
  0xdd   :  { %v1167_v3 = vadd.f32 %v1135_v39, %v1971_v21  ;;  %v1238_v32 = vadd.f32 %v1206_v44, %v1994_v19  ;;  %v2063_v24 = vadd.f32 %v884_v7, %v2037_v29  ;;  %v1136_v15 = vadd.f32 %v1100_v0, %v1986_v31  ;;  %v167_v31 = vld [vmem:[#allocation2 + $0x198] sm:$0xff] }
  0xde   :  { %v1037_v9 = vmul.f32 0.030364122, %v1948_v17  ;;  %v2068_v43 = vmul.f32 0.023647603, %v2050_v52  ;;  %v525_v16 = vadd.f32 %v485_v28, %v365_v61  ;;  %v645_v12 = vmul.f32 0.023647603, %v565_v6 }
  0xdf   :  { %v1207_v54 = vadd.f32 %v1167_v3, %v883_v5  ;;  %1270 = vst [vmem:[%s2184_s1 + $0xa8] sm:$0xff] %v1238_v32  ;;  %v1168_v1 = vadd.f32 %v1136_v15, %v1994_v19  ;;  %v206_v8 = vmul.f32 0.011170336, %v2007_v11  ;;  %v326_v49 = vmul.f32 0.023647603, %v246_v51 }
  0xe0   :  { %v1069_v13 = vadd.f32 %v1037_v9, %v1934_v20  ;;  %v805_v30 = vmul.f32 0.011170336, %v725_v10  ;;  %v1177_v2 = vmul.f32 0.011170336, %v2050_v52  ;;  %v486_v38 = vmul.f32 0.030364122, %v406_v18 }
  0xe1   :  { %v1239_v17 = vadd.f32 %v1207_v54, %v2025_v40  ;;  %v1208_v6 = vadd.f32 %v1168_v1, %v884_v7  ;;  %v685_v58 = vadd.f32 %v645_v12, %v525_v16  ;;  %v366_v50 = vadd.f32 %v326_v49, %v206_v8 }
  0xe2   :  { %v1101_v37 = vadd.f32 %v1069_v13, %v1971_v21  ;;  %v2082_v20 = vadd.f32 %v726_v41, %v606_v35  ;;  %v646_v11 = vmul.f32 0.023647603, %v566_v56  ;;  %v1038_v51 = vmul.f32 0.030364122, %v1973_v59  ;;  %v168_v21 = vld [vmem:[#allocation2 + $0x1a0] sm:$0xff] }
  0xe3   :  { %1271 = vst [vmem:[%s2184_s1 + $0xb0] sm:$0xff] %v1239_v17  ;;  %v207_v5 = vmul.f32 0.011170336, %v167_v31  ;;  %v1240_v18 = vadd.f32 %v1208_v6, %v2037_v29  ;;  %v526_v46 = vadd.f32 %v486_v38, %v366_v50  ;;  %v287_v42 = vadd.f32 %v247_v33, %v167_v31  ;;  %v727_v56 = vld [vmem:[#allocation2 + $0x19c] sm:$0xff]  ;;  %v249_v17 = vld [vmem:[#allocation2 + $0x1b1] sm:$0xff] }
  0xe4   :  { %v1137_v14 = vadd.f32 %v1101_v37, %v2018_v36  ;;  %v806_v48 = vmul.f32 0.011170336, %v726_v41  ;;  %v1070_v10 = vadd.f32 %v1038_v51, %v1977_v25  ;;  %v327_v7 = vmul.f32 0.023647603, %v247_v33  ;;  %v408_v25 = vld [vmem:[#allocation2 + $0x1a2] sm:$0xff]  ;;  %v409_v37 = vld [vmem:[#allocation2 + $0x1b2] sm:$0xff] }
  0xe5   :  { %v487_v53 = vmul.f32 0.030364122, %v407_v62  ;;  %1272 = vst [vmem:[%s2184_s1 + $0xb8] sm:$0xff] %v1240_v18  ;;  %v2091_v45 = vadd.f32 %v805_v30, %v685_v58  ;;  %v447_v39 = vadd.f32 %v407_v62, %v287_v42  ;;  %v647_v22 = vmul.f32 0.023647603, %v567_v63  ;;  %v728_v58 = vld [vmem:[#allocation2 + $0x1a4] sm:$0xff] }
  0xe6   :  { %v1169_v59 = vadd.f32 %v1137_v14, %v2025_v40  ;;  %v1102_v36 = vadd.f32 %v1070_v10, %v1994_v19  ;;  %v367_v44 = vadd.f32 %v327_v7, %v207_v5  ;;  %v1039_v0 = vmul.f32 0.030364122, %v1999_v26  ;;  %v568_v26 = vld [vmem:[#allocation2 + $0x1a3] sm:$0xff]  ;;  %v569_v14 = vld [vmem:[#allocation2 + $0x1b3] sm:$0xff] }
  0xe7   :  { %v208_v28 = vmul.f32 0.011170336, %v168_v21  ;;  %v686_v35 = vadd.f32 %v646_v11, %v526_v46  ;;  %v607_v61 = vadd.f32 %v567_v63, %v447_v39  ;;  %v288_v32 = vadd.f32 %v248_v4, %v168_v21  ;;  %v2116_v62 = vld [vmem:[#allocation2] sm:$0xff] }
  0xe8   :  { %v1209_v3 = vadd.f32 %v1177_v2, %v1169_v59  ;;  %v1138_v15 = vadd.f32 %v1102_v36, %v2030_v47  ;;  %v527_v9 = vadd.f32 %v487_v53, %v367_v44  ;;  %v1071_v54 = vadd.f32 %v1039_v0, %v1980_v57  ;;  %v410_v36 = vld [vmem:[#allocation2 + $0x1ba] sm:$0xff] }
  0xe9   :  { %v328_v16 = vmul.f32 0.023647603, %v248_v4  ;;  %v1178_v19 = vmul.f32 0.011170336, %v2082_v20  ;;  %v2100_v1 = vadd.f32 %v727_v56, %v607_v61  ;;  %v448_v13 = vadd.f32 %v408_v25, %v288_v32  ;;  %v250_v4 = vld [vmem:[#allocation2 + $0x1b9] sm:$0xff] }
  0xea   :  { %v1241_v12 = vadd.f32 %v1209_v3, %v2091_v45  ;;  %v1170_v8 = vadd.f32 %v1138_v15, %v2037_v29  ;;  %v1103_v49 = vadd.f32 %v1071_v54, %v2025_v40  ;;  %v488_v33 = vmul.f32 0.030364122, %v408_v25  ;;  %v570_v15 = vld [vmem:[#allocation2 + $0x1bb] sm:$0xff] }
  0xeb   :  { %v368_v31 = vadd.f32 %v328_v16, %v208_v28  ;;  %v2106_v47 = vadd.f32 %v2068_v43, %v2054_v34  ;;  %v2111_v57 = vadd.f32 %v806_v48, %v686_v35  ;;  %v687_v30 = vadd.f32 %v647_v22, %v527_v9  ;;  %v729_v28 = vld [vmem:[#allocation2 + $0x1b4] sm:$0xff] }
  0xec   :  { %1273 = vst [vmem:[%s2184_s1 + $0xc0] sm:$0xff] %v1241_v12  ;;  %v807_v2 = vmul.f32 0.011170336, %v727_v56  ;;  %v1210_v38 = vadd.f32 %v1178_v19, %v1170_v8  ;;  %v1139_v41 = vadd.f32 %v1103_v49, %v2068_v43  ;;  %v1179_v40 = vmul.f32 0.011170336, %v2100_v1 }
  0xed   :  { %v608_v6 = vadd.f32 %v568_v26, %v448_v13  ;;  %v648_v50 = vmul.f32 0.023647603, %v568_v26  ;;  %v1040_v34 = vmul.f32 0.030364122, %v2012_v27  ;;  %v2119_v63 = vmul.f32 0.011170336, %v2116_v62 }
  0xee   :  { %v289_v11 = vadd.f32 %v2116_v62, %v249_v17  ;;  %v1242_v51 = vadd.f32 %v1210_v38, %v2111_v57  ;;  %v1171_v5 = vadd.f32 %v1139_v41, %v2091_v45  ;;  %v528_v43 = vadd.f32 %v488_v33, %v368_v31  ;;  %v730_v38 = vld [vmem:[#allocation2 + $0x1bc] sm:$0xff]  ;;  %v411_v41 = vld [vmem:[#allocation2 + $0x1ca] sm:$0xff] }
  0xef   :  { %v329_v18 = vmul.f32 0.023647603, %v249_v17  ;;  %v948_v46 = vmul.f32 0.023647603, %v2082_v20  ;;  %v1072_v42 = vadd.f32 %v1040_v34, %v2010_v60  ;;  %v489_v27 = vmul.f32 0.030364122, %v409_v37 }
  0xf0   :  { %v449_v21 = vadd.f32 %v409_v37, %v289_v11  ;;  %1274 = vst [vmem:[%s2184_s1 + $0xc8] sm:$0xff] %v1242_v51  ;;  %v2129_v48 = vadd.f32 %v807_v2, %v687_v30  ;;  %v1211_v10 = vadd.f32 %v1179_v40, %v1171_v5  ;;  %v2131_v7 = vadd.f32 %v728_v58, %v608_v6 }
  0xf1   :  { %v369_v53 = vadd.f32 %v329_v18, %v2119_v63  ;;  %v808_v59 = vmul.f32 0.011170336, %v728_v58  ;;  %v1104_v39 = vadd.f32 %v1072_v42, %v2037_v29  ;;  %v1041_v60 = vmul.f32 0.030364122, %v2050_v52  ;;  %v252_v42 = vld [vmem:[#allocation2 + $0x1d1] sm:$0xff] }
  0xf2   :  { %v609_v22 = vadd.f32 %v569_v14, %v449_v21  ;;  %v1243_v44 = vadd.f32 %v1211_v10, %v2129_v48  ;;  %v688_v56 = vadd.f32 %v648_v50, %v528_v43  ;;  %v649_v0 = vmul.f32 0.023647603, %v569_v14  ;;  %v571_v14 = vld [vmem:[#allocation2 + $0x1cb] sm:$0xff] }
  0xf3   :  { %v290_v25 = vadd.f32 %v2116_v62, %v250_v4  ;;  %v1140_v3 = vadd.f32 %v1104_v39, %v948_v46  ;;  %v529_v35 = vadd.f32 %v489_v27, %v369_v53  ;;  %v1073_v61 = vadd.f32 %v1041_v60, %v2048_v23  ;;  %v251_v23 = vld [vmem:[#allocation2 + $0x1c9] sm:$0xff] }
  0xf4   :  { %v330_v32 = vmul.f32 0.023647603, %v250_v4  ;;  %1275 = vst [vmem:[%s2184_s1 + $0xd0] sm:$0xff] %v1243_v44  ;;  %v1180_v29 = vmul.f32 0.011170336, %v2131_v7  ;;  %v769_v12 = vadd.f32 %v729_v28, %v609_v22  ;;  %v2147_v26 = vadd.f32 %v808_v59, %v688_v56  ;;  %v412_v59 = vld [vmem:[#allocation2 + $0x1d2] sm:$0xff] }
  0xf5   :  { %v1109_v52 = vmul.f32 0.023647603, %v2100_v1  ;;  %v450_v9 = vadd.f32 %v410_v36, %v290_v25  ;;  %v490_v54 = vmul.f32 0.030364122, %v410_v36  ;;  %v1172_v16 = vadd.f32 %v1140_v3, %v2111_v57 }
  0xf6   :  { %v1105_v19 = vadd.f32 %v1073_v61, %v2091_v45  ;;  %v370_v13 = vadd.f32 %v330_v32, %v2119_v63  ;;  %v809_v8 = vmul.f32 0.011170336, %v729_v28  ;;  %v1042_v31 = vmul.f32 0.030364122, %v2082_v20 }
  0xf7   :  { %v610_v49 = vadd.f32 %v570_v15, %v450_v9  ;;  %v1212_v33 = vadd.f32 %v1180_v29, %v1172_v16  ;;  %v689_v17 = vadd.f32 %v649_v0, %v529_v35  ;;  %v650_v2 = vmul.f32 0.023647603, %v570_v15  ;;  %v731_v0 = vld [vmem:[#allocation2 + $0x1cc] sm:$0xff] }
  0xf8   :  { %v1141_v30 = vadd.f32 %v1109_v52, %v1105_v19  ;;  %v530_v40 = vadd.f32 %v490_v54, %v370_v13  ;;  %v1074_v6 = vadd.f32 %v1042_v31, %v2058_v55  ;;  %v291_v58 = vadd.f32 %v2116_v62, %v251_v23 }
  0xf9   :  { %v331_v37 = vmul.f32 0.023647603, %v251_v23  ;;  %v980_v50 = vadd.f32 %v948_v46, %v2063_v24  ;;  %v1244_v34 = vadd.f32 %v1212_v33, %v2147_v26  ;;  %v1181_v51 = vmul.f32 0.011170336, %v769_v12 }
  0xfa   :  { %v1173_v11 = vadd.f32 %v1141_v30, %v2129_v48  ;;  %v770_v20 = vadd.f32 %v730_v38, %v610_v49  ;;  %v1106_v5 = vadd.f32 %v1074_v6, %v2111_v57  ;;  %v1110_v43 = vmul.f32 0.023647603, %v2131_v7  ;;  %v732_v49 = vld [vmem:[#allocation2 + $0x1d4] sm:$0xff] }
  0xfb   :  { %v451_v18 = vadd.f32 %v411_v41, %v291_v58  ;;  %1276 = vst [vmem:[%s2184_s1 + $0xd8] sm:$0xff] %v1244_v34  ;;  %v849_v55 = vadd.f32 %v809_v8, %v689_v17  ;;  %v371_v24 = vadd.f32 %v331_v37, %v2119_v63  ;;  %v491_v46 = vmul.f32 0.030364122, %v411_v41 }
  0xfc   :  { %v1213_v21 = vadd.f32 %v1181_v51, %v1173_v11  ;;  %v690_v27 = vadd.f32 %v650_v2, %v530_v40  ;;  %v810_v4 = vmul.f32 0.011170336, %v730_v38  ;;  %v1142_v10 = vadd.f32 %v1110_v43, %v1106_v5 }
  0xfd   :  { %v1011_v53 = vadd.f32 %v2106_v47, %v2091_v45  ;;  %v611_v22 = vadd.f32 %v571_v14, %v451_v18  ;;  %v1043_v60 = vmul.f32 0.030364122, %v2100_v1  ;;  %v292_v36 = vadd.f32 %v2116_v62, %v252_v42  ;;  %v572_v47 = vld [vmem:[#allocation2 + $0x1d3] sm:$0xff] }
  0xfe   :  { %v1245_v39 = vadd.f32 %v1213_v21, %v849_v55  ;;  %v1174_v44 = vadd.f32 %v1142_v10, %v2147_v26  ;;  %v1182_v56 = vmul.f32 0.011170336, %v770_v20  ;;  %v332_v28 = vmul.f32 0.023647603, %v252_v42 }
  0xff   :  { %v531_v25 = vadd.f32 %v491_v46, %v371_v24  ;;  %v651_v3 = vmul.f32 0.023647603, %v571_v14  ;;  %v1075_v35 = vadd.f32 %v1043_v60, %v1011_v53  ;;  %v452_v45 = vadd.f32 %v412_v59, %v292_v36 }
 0x100   :  { %1277 = vst [vmem:[%s2184_s1 + $0xe0] sm:$0xff] %v1245_v39  ;;  %v850_v61 = vadd.f32 %v810_v4, %v690_v27  ;;  %v1214_v32 = vadd.f32 %v1182_v56, %v1174_v44  ;;  %v372_v1 = vadd.f32 %v332_v28, %v2119_v63  ;;  %v492_v15 = vmul.f32 0.030364122, %v412_v59 }
 0x101   :  { %v771_v62 = vadd.f32 %v731_v0, %v611_v22  ;;  %v1107_v29 = vadd.f32 %v1075_v35, %v2129_v48  ;;  %v1111_v52 = vmul.f32 0.023647603, %v769_v12  ;;  %v1012_v9 = vadd.f32 %v980_v50, %v2111_v57 }
 0x102   :  { %v1246_v54 = vadd.f32 %v1214_v32, %v850_v61  ;;  %v612_v16 = vadd.f32 %v572_v47, %v452_v45  ;;  %v1044_v19 = vmul.f32 0.030364122, %v2131_v7  ;;  %v691_v13 = vadd.f32 %v651_v3, %v531_v25 }
 0x103   :  { %v811_v23 = vmul.f32 0.011170336, %v731_v0  ;;  %v1143_v8 = vadd.f32 %v1111_v52, %v1107_v29  ;;  %v532_v63 = vadd.f32 %v492_v15, %v372_v1  ;;  %v652_v31 = vmul.f32 0.023647603, %v572_v47 }
 0x104   :  { %1278 = vst [vmem:[%s2184_s1 + $0xe8] sm:$0xff] %v1246_v54  ;;  %v1076_v33 = vadd.f32 %v1044_v19, %v1012_v9  ;;  %v1183_v48 = vmul.f32 0.011170336, %v771_v62  ;;  %v772_v12 = vadd.f32 %v732_v49, %v612_v16  ;;  %v1112_v30 = vmul.f32 0.023647603, %v770_v20 }
 0x105   :  { %v1175_v17 = vadd.f32 %v1143_v8, %v849_v55  ;;  %v851_v2 = vadd.f32 %v811_v23, %v691_v13  ;;  %v692_v7 = vadd.f32 %v652_v31, %v532_v63  ;;  %v812_v41 = vmul.f32 0.011170336, %v732_v49 }
 0x106   :  { %v1108_v57 = vadd.f32 %v1076_v33, %v2147_v26  ;;  %v1184_v37 = vmul.f32 0.011170336, %v772_v12 }
 0x107   :  { %v1215_v38 = vadd.f32 %v1183_v48, %v1175_v17  ;;  %v852_v50 = vadd.f32 %v812_v41, %v692_v7 }
 0x108   :  { %v1144_v40 = vadd.f32 %v1112_v30, %v1108_v57 }
 0x109   :  { %v1247_v6 = vadd.f32 %v1215_v38, %v851_v2 }
 0x10a   :  { %v1176_v58 = vadd.f32 %v1144_v40, %v850_v61 }
 0x10b   :  { %1279 = vst [vmem:[%s2184_s1 + $0xf0] sm:$0xff] %v1247_v6 }
 0x10c   :  { %v1216_v34 = vadd.f32 %v1184_v37, %v1176_v58 }
 0x10e   :  { %v1248_v11 = vadd.f32 %v1216_v34, %v852_v50 }
 0x110   :  { %1280 = vst [vmem:[%s2184_s1 + $0xf8] sm:$0xff] %v1248_v11 }

</bundles_post_ra>
